<compile_context>
chip_gen: v6e
topology: v6e:2x2x1
jax: 0.10.0
libtpu: 0.0.40
codegen_flags: <defaults>
</compile_context>

<pallas_src>
import jax
import jax.numpy as jnp
from jax.experimental import pallas as pl
from jax.experimental.pallas import tpu as pltpu


def _round_up(x, m):
    return (x + m - 1) // m * m


# ---------------------------------------------------------------------------
# Fused GEMM + bias + sigmoid kernel (one grid axis over output rows)
# ---------------------------------------------------------------------------
def _conv_mm_sigmoid_kernel(x_ref, w_ref, b_ref, o_ref):
    y = jnp.dot(x_ref[...], w_ref[...], preferred_element_type=jnp.float32)
    y = y + b_ref[...]
    o_ref[...] = (1.0 / (1.0 + jnp.exp(-y))).astype(o_ref.dtype)


def conv3d_sigmoid(x, w, b):
    """sigmoid(Conv3d(x)) with kernel (3,3,3), padding (0,1,1), stride 1.

    x: (B, Cin, D, H, W)   w: (Cout, Cin, 3, 3, 3)   b: (Cout,)
    returns (B, Cout, D-2, H, W)
    """
    B, Cin, D, H, W = x.shape
    Cout, _, kD, kH, kW = w.shape
    Dout = D - (kD - 1)          # no padding along depth
    assert Dout >= 1

    # channels-last, zero-pad H and W by 1 (padding=(0,1,1))
    x_cl = jnp.transpose(x, (0, 2, 3, 4, 1))                      # (B,D,H,W,Cin)
    xp = jnp.pad(x_cl, ((0, 0), (0, 0), (1, 1), (1, 1), (0, 0)))

    # im2col over the 27 taps: tap (kd,kh,kw) outer, channel inner
    cols = [xp[:, kd:kd + Dout, kh:kh + H, kw:kw + W, :]
            for kd in range(kD) for kh in range(kH) for kw in range(kW)]
    cols = jnp.concatenate(cols, axis=-1)                         # (B,Dout,H,W,27*Cin)

    M = B * Dout * H * W
    K = kD * kH * kW * Cin
    xmat = cols.reshape(M, K)

    # weight -> (K, Cout) matching the (kd,kh,kw,cin) im2col ordering
    wmat = jnp.transpose(w, (2, 3, 4, 1, 0)).reshape(K, Cout)

    # guarded padding: only pad when not already aligned
    Kp = _round_up(K, 128)
    if Kp != K:
        xmat = jnp.pad(xmat, ((0, 0), (0, Kp - K)))
        wmat = jnp.pad(wmat, ((0, Kp - K), (0, 0)))
    tm = min(512, _round_up(M, 8))
    Mp = _round_up(M, tm)
    if Mp != M:
        xmat = jnp.pad(xmat, ((0, Mp - M), (0, 0)))

    out = pl.pallas_call(
        _conv_mm_sigmoid_kernel,
        out_shape=jax.ShapeDtypeStruct((Mp, Cout), jnp.float32),
        grid=(Mp // tm,),
        in_specs=[
            pl.BlockSpec((tm, Kp), lambda i: (i, 0)),     # activations (whole K)
            pl.BlockSpec((Kp, Cout), lambda i: (0, 0)),   # weights (resident)
            pl.BlockSpec((1, Cout), lambda i: (0, 0)),    # bias (resident)
        ],
        out_specs=pl.BlockSpec((tm, Cout), lambda i: (i, 0)),
        compiler_params=pltpu.CompilerParams(
            dimension_semantics=("parallel",)),
    )(xmat, wmat, b.reshape(1, Cout))

    out = out[:M].reshape(B, Dout, H, W, Cout)
    return jnp.transpose(out, (0, 4, 1, 2, 3))                    # (B,Cout,Dout,H,W)


if __name__ == "__main__":
    key = jax.random.PRNGKey(0)
    kx, kw, kb = jax.random.split(key, 3)

    B, Cin, D, H, W = 2, 16, 8, 16, 16
    Cout, kD, kH, kW_ = 16, 3, 3, 3

    x = jax.random.normal(kx, (B, Cin, D, H, W), jnp.float32)
    fan_in = Cin * kD * kH * kW_
    bound = fan_in ** -0.5
    w = jax.random.uniform(kw, (Cout, Cin, kD, kH, kW_), jnp.float32,
                           minval=-bound, maxval=bound)
    b = jax.random.uniform(kb, (Cout,), jnp.float32,
                           minval=-bound, maxval=bound)

    fwd = jax.jit(conv3d_sigmoid)
    out = fwd(x, w, b)
    jax.block_until_ready(out)
    assert out.shape == (B, Cout, D - 2, H, W), out.shape

    # Reference check against XLA's 3-D convolution + sigmoid.
    ref = jax.lax.conv_general_dilated(
        x, w, window_strides=(1, 1, 1),
        padding=((0, 0), (1, 1), (1, 1)),
        dimension_numbers=("NCDHW", "OIDHW", "NCDHW"),
        precision=jax.lax.Precision.HIGHEST)
    ref = 1.0 / (1.0 + jnp.exp(-(ref + b.reshape(1, Cout, 1, 1, 1))))
    max_err = float(jnp.max(jnp.abs(out - ref)))
    assert jnp.allclose(out, ref, atol=1e-3, rtol=1e-3), max_err
    assert bool(jnp.all(jnp.isfinite(out)))
    print("KERNEL_OK")
</pallas_src>

<mosaic_0001>
module attributes {stable_mosaic.version = 11 : i64} {
  func.func @_conv_mm_sigmoid_kernel(%arg0: i32, %arg1: memref<512x512xf32, #tpu.memory_space<vmem>>, %arg2: memref<512x16xf32, #tpu.memory_space<vmem>>, %arg3: memref<1x16xf32, #tpu.memory_space<vmem>>, %arg4: memref<512x16xf32, #tpu.memory_space<vmem>>) attributes {dimension_semantics = [#tpu.dimension_semantics<parallel>], iteration_bounds = array<i64: 6>, scalar_prefetch = 0 : i64, scratch_operands = 0 : i64, tpu.core_type = #tpu.core_type<tc>, window_params = [{transform_indices = @transform_0, window_bounds = array<i64: 512, 512>}, {pipeline_mode = #tpu.pipeline_mode<synchronous>, transform_indices = @transform_1, window_bounds = array<i64: 512, 16>}, {pipeline_mode = #tpu.pipeline_mode<synchronous>, transform_indices = @transform_2, window_bounds = array<i64: 1, 16>}, {transform_indices = @transform_3, window_bounds = array<i64: 512, 16>}]} {
    %c0 = arith.constant 0 : index
    %c0_0 = arith.constant 0 : index
    %0 = vector.load %arg1[%c0, %c0_0] : memref<512x512xf32, #tpu.memory_space<vmem>>, vector<512x512xf32>
    %c0_1 = arith.constant 0 : index
    %c0_2 = arith.constant 0 : index
    %1 = vector.load %arg2[%c0_1, %c0_2] : memref<512x16xf32, #tpu.memory_space<vmem>>, vector<512x16xf32>
    %cst = arith.constant dense<0.000000e+00> : vector<512x16xf32>
    %2 = tpu.matmul %0, %1, %cst {dimension_numbers = #tpu.dot_dimension_numbers<[1], [0], [0], [1], [0, 0, 1, 1], [], []>} : vector<512x512xf32>, vector<512x16xf32>, vector<512x16xf32> -> vector<512x16xf32>
    %c0_3 = arith.constant 0 : index
    %c0_4 = arith.constant 0 : index
    %3 = vector.load %arg3[%c0_3, %c0_4] : memref<1x16xf32, #tpu.memory_space<vmem>>, vector<1x16xf32>
    %4 = vector.broadcast %3 : vector<1x16xf32> to vector<512x16xf32>
    %5 = arith.addf %2, %4 : vector<512x16xf32>
    %cst_5 = arith.constant 0.000000e+00 : f32
    %6 = vector.broadcast %cst_5 : f32 to vector<512x16xf32>
    %7 = arith.subf %6, %5 : vector<512x16xf32>
    %8 = math.exp %7 : vector<512x16xf32>
    %cst_6 = arith.constant 1.000000e+00 : f32
    %9 = vector.broadcast %cst_6 : f32 to vector<512x16xf32>
    %10 = arith.addf %9, %8 : vector<512x16xf32>
    %cst_7 = arith.constant 1.000000e+00 : f32
    %11 = vector.broadcast %cst_7 : f32 to vector<512x16xf32>
    %12 = arith.divf %11, %10 : vector<512x16xf32>
    %c0_8 = arith.constant 0 : index
    %c0_9 = arith.constant 0 : index
    %13 = vector.load %arg4[%c0_8, %c0_9] : memref<512x16xf32, #tpu.memory_space<vmem>>, vector<512x16xf32>
    tpu.vector_store %arg4[%c0_8, %c0_9], %12 {strides = array<i32>} : memref<512x16xf32, #tpu.memory_space<vmem>>, vector<512x16xf32>,
    return
  }
  func.func @transform_0(%arg0: i32) -> (i32, i32) {
    %c0_i32 = arith.constant 0 : i32
    %c0_i32_0 = arith.constant 0 : i32
    return %arg0, %c0_i32 : i32, i32
  }
  func.func @transform_1(%arg0: i32) -> (i32, i32) {
    %c0_i32 = arith.constant 0 : i32
    %c0_i32_0 = arith.constant 0 : i32
    %c0_i32_1 = arith.constant 0 : i32
    return %c0_i32, %c0_i32_0 : i32, i32
  }
  func.func @transform_2(%arg0: i32) -> (i32, i32) {
    %c0_i32 = arith.constant 0 : i32
    %c0_i32_0 = arith.constant 0 : i32
    %c0_i32_1 = arith.constant 0 : i32
    return %c0_i32, %c0_i32_0 : i32, i32
  }
  func.func @transform_3(%arg0: i32) -> (i32, i32) {
    %c0_i32 = arith.constant 0 : i32
    %c0_i32_0 = arith.constant 0 : i32
    return %arg0, %c0_i32 : i32, i32
  }
}

</mosaic_0001>

<bundles_post_ra>
// kernel: conv3d_sigmoid.1
= control target key start
LH: loop header
LB: loop body
LE: loop exit
PB: predicated region body
PF: predicated region fallthrough
CT: control target
= control target key end

     0   :  { %s2088_s12 = smov 0   ;;  %s2829_s0 = inlined_call_operand.vmem [shape: f32[3072,512], index: 0, kind: input, shape index: {}]   ;;  %s2830_s1 = inlined_call_operand.vmem [shape: f32[512,16], index: 1, kind: input, shape index: {}]   ;;  %s2831_s2 = inlined_call_operand.vmem [shape: f32[1,16], index: 2, kind: input, shape index: {}]   ;;  %s2832_s3 = inlined_call_operand.vmem [shape: f32[3072,16], index: 3, kind: output, shape index: {}]  }
   0x1 LB: > { %s1779_s13 = sadd.s32 4294967295, %s2065_s12   ;;  %p1783_p0 = scmp.ge.s32.totalorder %s2065_s12, 1  ;;  %s2065_s12 = sphi %s2088_s12, %s13_s12  }
   0x2   : > { %p139_p1 = scmp.lt.s32.totalorder %s2065_s12, 7 }
   0x4   : > { %p140_p2 = pnand %p1783_p0, %p139_p1 }
   0x5   : > { %s1784_s4 = sshll.u32 (!%p140_p2), %s1779_s13, 6 }
   0x6   : > { %143 = sbr.rel (%p140_p2) target bundleno = 562 (0x232), region = 32  ;;  %p165_p3 = scmp.lt.s32.totalorder (!%p140_p2), %s1784_s4, 383 }
   0xb   : > { %v448_v0 = vld [vmem:[%s2830_s1 + $0x78] sm:$0xff]  ;;  %v2067_v2 = vmov 0.0   ;;  %v447_v3 = vld [vmem:[%s2830_s1 + $0x70] sm:$0xff]  ;;  %v446_v5 = vld [vmem:[%s2830_s1 + $0x68] sm:$0xff]  ;;  %s2834_s4 = smov (!%p165_p3, %s1784_s4), 383  ;;  %vm1658_vm0 = vcmask 130048  }
   0xc   : > { %v480_v1 = vld [vmem:[%s2830_s1 + $0x178] sm:$0xff]  ;;  %504 = vmatprep.subr.mxu0 %v2067_v2  ;;  %889 = vmatprep.subr.mxu1 %v2067_v2  ;;  %v479_v4 = vld [vmem:[%s2830_s1 + $0x170] sm:$0xff]  ;;  %v478_v6 = vld [vmem:[%s2830_s1 + $0x168] sm:$0xff]  ;;  %s1792_s30 = sshll.u32 %s2834_s4, 5  ;;  %s1788_s23 = sshll.u32 %s2834_s4, 3 }
   0xd   : > { %505 = vmatpush1.msra.mxu0 %v448_v0  ;;  %890 = vmatpush1.msra.mxu1 %v480_v1  ;;  %v445_v7 = vld [vmem:[%s2830_s1 + $0x60] sm:$0xff]  ;;  %v444_v9 = vld [vmem:[%s2830_s1 + $0x58] sm:$0xff]  ;;  %v443_v11 = vld [vmem:[%s2830_s1 + $0x50] sm:$0xff]  ;;  %s2342_s10 = scalar_lea.vmem %s2829_s0, %s1792_s30  ;;  %s2614_s25 = scalar_lea.vmem %s2832_s3, %s1788_s23 }
   0xe   : > { %506 = vmatprep.subr.mxu0 %v2067_v2  ;;  %891 = vmatprep.subr.mxu1 %v2067_v2  ;;  %v477_v8 = vld [vmem:[%s2830_s1 + $0x160] sm:$0xff]  ;;  %v476_v10 = vld [vmem:[%s2830_s1 + $0x158] sm:$0xff]  ;;  %v475_v12 = vld [vmem:[%s2830_s1 + $0x150] sm:$0xff] }
   0xf   : > { %507 = vmatpush1.msra.mxu0 %v447_v3  ;;  %892 = vmatpush1.msra.mxu1 %v479_v4  ;;  %v442_v13 = vld [vmem:[%s2830_s1 + $0x48] sm:$0xff]  ;;  %v441_v15 = vld [vmem:[%s2830_s1 + $0x40] sm:$0xff]  ;;  %v440_v17 = vld [vmem:[%s2830_s1 + $0x38] sm:$0xff] }
  0x10   : > { %508 = vmatprep.subr.mxu0 %v2067_v2  ;;  %893 = vmatprep.subr.mxu1 %v2067_v2  ;;  %v474_v14 = vld [vmem:[%s2830_s1 + $0x148] sm:$0xff]  ;;  %v473_v16 = vld [vmem:[%s2830_s1 + $0x140] sm:$0xff]  ;;  %v472_v18 = vld [vmem:[%s2830_s1 + $0x138] sm:$0xff] }
  0x11   : > { %509 = vmatpush1.msra.mxu0 %v446_v5  ;;  %894 = vmatpush1.msra.mxu1 %v478_v6  ;;  %v439_v19 = vld [vmem:[%s2830_s1 + $0x30] sm:$0xff]  ;;  %v438_v21 = vld [vmem:[%s2830_s1 + $0x28] sm:$0xff]  ;;  %v437_v23 = vld [vmem:[%s2830_s1 + $0x20] sm:$0xff] }
  0x12   : > { %510 = vmatprep.subr.mxu0 %v2067_v2  ;;  %895 = vmatprep.subr.mxu1 %v2067_v2  ;;  %v471_v20 = vld [vmem:[%s2830_s1 + $0x130] sm:$0xff]  ;;  %v470_v22 = vld [vmem:[%s2830_s1 + $0x128] sm:$0xff]  ;;  %v469_v24 = vld [vmem:[%s2830_s1 + $0x120] sm:$0xff] }
  0x13   : > { %511 = vmatpush1.msra.mxu0 %v445_v7  ;;  %896 = vmatpush1.msra.mxu1 %v477_v8  ;;  %v436_v25 = vld [vmem:[%s2830_s1 + $0x18] sm:$0xff]  ;;  %v435_v27 = vld [vmem:[%s2830_s1 + $0x10] sm:$0xff]  ;;  %v434_v29 = vld [vmem:[%s2830_s1 + $0x8] sm:$0xff] }
  0x14   : > { %512 = vmatprep.subr.mxu0 %v2067_v2  ;;  %897 = vmatprep.subr.mxu1 %v2067_v2  ;;  %v468_v26 = vld [vmem:[%s2830_s1 + $0x118] sm:$0xff]  ;;  %v467_v28 = vld [vmem:[%s2830_s1 + $0x110] sm:$0xff]  ;;  %v466_v30 = vld [vmem:[%s2830_s1 + $0x108] sm:$0xff] }
  0x15   : > { %513 = vmatpush1.msra.mxu0 %v444_v9  ;;  %898 = vmatpush1.msra.mxu1 %v476_v10  ;;  %v433_v31 = vld [vmem:[%s2830_s1] sm:$0xff]  ;;  %v464_v33 = vld [vmem:[%s2830_s1 + $0xf8] sm:$0xff]  ;;  %v463_v35 = vld [vmem:[%s2830_s1 + $0xf0] sm:$0xff] }
  0x16   : > { %514 = vmatprep.subr.mxu0 %v2067_v2  ;;  %899 = vmatprep.subr.mxu1 %v2067_v2  ;;  %v465_v32 = vld [vmem:[%s2830_s1 + $0x100] sm:$0xff]  ;;  %v496_v34 = vld [vmem:[%s2830_s1 + $0x1f8] sm:$0xff]  ;;  %v495_v36 = vld [vmem:[%s2830_s1 + $0x1f0] sm:$0xff] }
  0x17   : > { %515 = vmatpush1.msra.mxu0 %v443_v11  ;;  %900 = vmatpush1.msra.mxu1 %v475_v12  ;;  %v462_v37 = vld [vmem:[%s2830_s1 + $0xe8] sm:$0xff]  ;;  %v461_v39 = vld [vmem:[%s2830_s1 + $0xe0] sm:$0xff]  ;;  %v460_v41 = vld [vmem:[%s2830_s1 + $0xd8] sm:$0xff] }
  0x18   : > { %516 = vmatprep.subr.mxu0 %v2067_v2  ;;  %901 = vmatprep.subr.mxu1 %v2067_v2  ;;  %v494_v38 = vld [vmem:[%s2830_s1 + $0x1e8] sm:$0xff]  ;;  %v493_v40 = vld [vmem:[%s2830_s1 + $0x1e0] sm:$0xff]  ;;  %v492_v42 = vld [vmem:[%s2830_s1 + $0x1d8] sm:$0xff] }
  0x19   : > { %517 = vmatpush1.msra.mxu0 %v442_v13  ;;  %902 = vmatpush1.msra.mxu1 %v474_v14  ;;  %v459_v43 = vld [vmem:[%s2830_s1 + $0xd0] sm:$0xff]  ;;  %v458_v45 = vld [vmem:[%s2830_s1 + $0xc8] sm:$0xff]  ;;  %v457_v47 = vld [vmem:[%s2830_s1 + $0xc0] sm:$0xff] }
  0x1a   : > { %518 = vmatprep.subr.mxu0 %v2067_v2  ;;  %903 = vmatprep.subr.mxu1 %v2067_v2  ;;  %v491_v44 = vld [vmem:[%s2830_s1 + $0x1d0] sm:$0xff]  ;;  %v490_v46 = vld [vmem:[%s2830_s1 + $0x1c8] sm:$0xff]  ;;  %v489_v48 = vld [vmem:[%s2830_s1 + $0x1c0] sm:$0xff] }
  0x1b   : > { %519 = vmatpush1.msra.mxu0 %v441_v15  ;;  %904 = vmatpush1.msra.mxu1 %v473_v16  ;;  %v456_v49 = vld [vmem:[%s2830_s1 + $0xb8] sm:$0xff]  ;;  %v455_v51 = vld [vmem:[%s2830_s1 + $0xb0] sm:$0xff]  ;;  %v454_v53 = vld [vmem:[%s2830_s1 + $0xa8] sm:$0xff] }
  0x1c   : > { %520 = vmatprep.subr.mxu0 %v2067_v2  ;;  %905 = vmatprep.subr.mxu1 %v2067_v2  ;;  %v488_v50 = vld [vmem:[%s2830_s1 + $0x1b8] sm:$0xff]  ;;  %v487_v52 = vld [vmem:[%s2830_s1 + $0x1b0] sm:$0xff]  ;;  %v486_v54 = vld [vmem:[%s2830_s1 + $0x1a8] sm:$0xff] }
  0x1d   : > { %521 = vmatpush1.msra.mxu0 %v440_v17  ;;  %906 = vmatpush1.msra.mxu1 %v472_v18  ;;  %v453_v55 = vld [vmem:[%s2830_s1 + $0xa0] sm:$0xff]  ;;  %v452_v57 = vld [vmem:[%s2830_s1 + $0x98] sm:$0xff]  ;;  %v451_v59 = vld [vmem:[%s2830_s1 + $0x90] sm:$0xff] }
  0x1e   : > { %522 = vmatprep.subr.mxu0 %v2067_v2  ;;  %907 = vmatprep.subr.mxu1 %v2067_v2  ;;  %v485_v56 = vld [vmem:[%s2830_s1 + $0x1a0] sm:$0xff]  ;;  %v484_v58 = vld [vmem:[%s2830_s1 + $0x198] sm:$0xff]  ;;  %v483_v60 = vld [vmem:[%s2830_s1 + $0x190] sm:$0xff] }
  0x1f   : > { %523 = vmatpush1.msra.mxu0 %v439_v19  ;;  %908 = vmatpush1.msra.mxu1 %v471_v20  ;;  %v450_v61 = vld [vmem:[%s2830_s1 + $0x88] sm:$0xff]  ;;  %v449_v63 = vld [vmem:[%s2830_s1 + $0x80] sm:$0xff]  ;;  %v180_v3 = vld [vmem:[%s2342_s10 + $0x18] sm:$0xff] }
  0x20   : > { %524 = vmatprep.subr.mxu0 %v2067_v2  ;;  %909 = vmatprep.subr.mxu1 %v2067_v2  ;;  %v482_v62 = vld [vmem:[%s2830_s1 + $0x188] sm:$0xff]  ;;  %v481_v1 = vld [vmem:[%s2830_s1 + $0x180] sm:$0xff]  ;;  %v179_v5 = vld [vmem:[%s2342_s10 + $0x10] sm:$0xff] }
  0x21   : > { %525 = vmatpush1.msra.mxu0 %v438_v21  ;;  %910 = vmatpush1.msra.mxu1 %v470_v22  ;;  %v178_v0 = vld [vmem:[%s2342_s10 + $0x8] sm:$0xff]  ;;  %v177_v4 = vld [vmem:[%s2342_s10] sm:$0xff]  ;;  %v184_v7 = vld [vmem:[%s2342_s10 + $0x38] sm:$0xff] }
  0x22   : > { %526 = vmatprep.subr.mxu0 %v2067_v2  ;;  %911 = vmatprep.subr.mxu1 %v2067_v2  ;;  %v182_v6 = vld [vmem:[%s2342_s10 + $0x28] sm:$0xff]  ;;  %v181_v8 = vld [vmem:[%s2342_s10 + $0x20] sm:$0xff]  ;;  %v188_v10 = vld [vmem:[%s2342_s10 + $0x58] sm:$0xff] }
  0x23   : > { %527 = vmatpush1.msra.mxu0 %v437_v23  ;;  %912 = vmatpush1.msra.mxu1 %v469_v24  ;;  %v186_v9 = vld [vmem:[%s2342_s10 + $0x48] sm:$0xff]  ;;  %v185_v11 = vld [vmem:[%s2342_s10 + $0x40] sm:$0xff]  ;;  %v187_v12 = vld [vmem:[%s2342_s10 + $0x50] sm:$0xff] }
  0x24   : > { %528 = vmatprep.subr.mxu0 %v2067_v2  ;;  %913 = vmatprep.subr.mxu1 %v2067_v2  ;;  %v190_v13 = vld [vmem:[%s2342_s10 + $0x68] sm:$0xff]  ;;  %v192_v14 = vld [vmem:[%s2342_s10 + $0x78] sm:$0xff]  ;;  %v189_v15 = vld [vmem:[%s2342_s10 + $0x60] sm:$0xff] }
  0x25   : > { %529 = vmatpush1.msra.mxu0 %v436_v25  ;;  %914 = vmatpush1.msra.mxu1 %v468_v26  ;;  %v191_v16 = vld [vmem:[%s2342_s10 + $0x70] sm:$0xff]  ;;  %v194_v17 = vld [vmem:[%s2342_s10 + $0x88] sm:$0xff]  ;;  %v196_v18 = vld [vmem:[%s2342_s10 + $0x98] sm:$0xff] }
  0x26   : > { %530 = vmatprep.subr.mxu0 %v2067_v2  ;;  %915 = vmatprep.subr.mxu1 %v2067_v2  ;;  %v193_v19 = vld [vmem:[%s2342_s10 + $0x80] sm:$0xff]  ;;  %v195_v20 = vld [vmem:[%s2342_s10 + $0x90] sm:$0xff]  ;;  %v198_v21 = vld [vmem:[%s2342_s10 + $0xa8] sm:$0xff] }
  0x27   : > { %531 = vmatpush1.msra.mxu0 %v435_v27  ;;  %916 = vmatpush1.msra.mxu1 %v467_v28  ;;  %v200_v22 = vld [vmem:[%s2342_s10 + $0xb8] sm:$0xff]  ;;  %v197_v23 = vld [vmem:[%s2342_s10 + $0xa0] sm:$0xff]  ;;  %v199_v24 = vld [vmem:[%s2342_s10 + $0xb0] sm:$0xff] }
  0x28   : > { %532 = vmatprep.subr.mxu0 %v2067_v2  ;;  %917 = vmatprep.subr.mxu1 %v2067_v2  ;;  %v202_v25 = vld [vmem:[%s2342_s10 + $0xc8] sm:$0xff]  ;;  %v204_v26 = vld [vmem:[%s2342_s10 + $0xd8] sm:$0xff]  ;;  %v201_v27 = vld [vmem:[%s2342_s10 + $0xc0] sm:$0xff] }
  0x29   : > { %533 = vmatpush1.msra.mxu0 %v434_v29  ;;  %918 = vmatpush1.msra.mxu1 %v466_v30  ;;  %v203_v28 = vld [vmem:[%s2342_s10 + $0xd0] sm:$0xff]  ;;  %v206_v29 = vld [vmem:[%s2342_s10 + $0xe8] sm:$0xff]  ;;  %v208_v30 = vld [vmem:[%s2342_s10 + $0xf8] sm:$0xff] }
  0x2a   : > { %534 = vmatprep.subr.mxu0 %v2067_v2  ;;  %919 = vmatprep.subr.mxu1 %v2067_v2 }
  0x2b   : > { %535 = vmatpush1.msra.mxu0 %v433_v31  ;;  %920 = vmatpush1.msra.mxu1 %v465_v32  ;;  %v205_v31 = vld [vmem:[%s2342_s10 + $0xe0] sm:$0xff]  ;;  %v207_v32 = vld [vmem:[%s2342_s10 + $0xf0] sm:$0xff] }
  0x2c   : > { %536 = vmatprep.subr.mxu0 %v2067_v2  ;;  %921 = vmatprep.subr.mxu1 %v2067_v2 }
  0x2d   : > { %537 = vmatpush2.msra.mxu0 %v464_v33  ;;  %922 = vmatpush2.msra.mxu1 %v496_v34  ;;  %v210_v33 = vld [vmem:[%s2342_s10 + $0x108] sm:$0xff]  ;;  %v212_v34 = vld [vmem:[%s2342_s10 + $0x118] sm:$0xff] }
  0x2e   : > { %538 = vmatprep.subr.mxu0 %v2067_v2  ;;  %923 = vmatprep.subr.mxu1 %v2067_v2 }
  0x2f   : > { %539 = vmatpush2.msra.mxu0 %v463_v35  ;;  %924 = vmatpush2.msra.mxu1 %v495_v36  ;;  %v209_v35 = vld [vmem:[%s2342_s10 + $0x100] sm:$0xff]  ;;  %v211_v36 = vld [vmem:[%s2342_s10 + $0x110] sm:$0xff] }
  0x30   : > { %540 = vmatprep.subr.mxu0 %v2067_v2  ;;  %925 = vmatprep.subr.mxu1 %v2067_v2 }
  0x31   : > { %541 = vmatpush2.msra.mxu0 %v462_v37  ;;  %926 = vmatpush2.msra.mxu1 %v494_v38  ;;  %v214_v37 = vld [vmem:[%s2342_s10 + $0x128] sm:$0xff]  ;;  %v216_v38 = vld [vmem:[%s2342_s10 + $0x138] sm:$0xff] }
  0x32   : > { %542 = vmatprep.subr.mxu0 %v2067_v2  ;;  %927 = vmatprep.subr.mxu1 %v2067_v2 }
  0x33   : > { %543 = vmatpush2.msra.mxu0 %v461_v39  ;;  %928 = vmatpush2.msra.mxu1 %v493_v40  ;;  %v213_v39 = vld [vmem:[%s2342_s10 + $0x120] sm:$0xff]  ;;  %v215_v40 = vld [vmem:[%s2342_s10 + $0x130] sm:$0xff] }
  0x34   : > { %544 = vmatprep.subr.mxu0 %v2067_v2  ;;  %929 = vmatprep.subr.mxu1 %v2067_v2 }
  0x35   : > { %545 = vmatpush2.msra.mxu0 %v460_v41  ;;  %930 = vmatpush2.msra.mxu1 %v492_v42  ;;  %v218_v41 = vld [vmem:[%s2342_s10 + $0x148] sm:$0xff]  ;;  %v220_v42 = vld [vmem:[%s2342_s10 + $0x158] sm:$0xff] }
  0x36   : > { %546 = vmatprep.subr.mxu0 %v2067_v2  ;;  %931 = vmatprep.subr.mxu1 %v2067_v2 }
  0x37   : > { %547 = vmatpush2.msra.mxu0 %v459_v43  ;;  %932 = vmatpush2.msra.mxu1 %v491_v44  ;;  %v217_v43 = vld [vmem:[%s2342_s10 + $0x140] sm:$0xff]  ;;  %v219_v44 = vld [vmem:[%s2342_s10 + $0x150] sm:$0xff] }
  0x38   : > { %548 = vmatprep.subr.mxu0 %v2067_v2  ;;  %933 = vmatprep.subr.mxu1 %v2067_v2 }
  0x39   : > { %549 = vmatpush2.msra.mxu0 %v458_v45  ;;  %934 = vmatpush2.msra.mxu1 %v490_v46  ;;  %v222_v45 = vld [vmem:[%s2342_s10 + $0x168] sm:$0xff]  ;;  %v224_v46 = vld [vmem:[%s2342_s10 + $0x178] sm:$0xff] }
  0x3a   : > { %550 = vmatprep.subr.mxu0 %v2067_v2  ;;  %935 = vmatprep.subr.mxu1 %v2067_v2 }
  0x3b   : > { %551 = vmatpush2.msra.mxu0 %v457_v47  ;;  %936 = vmatpush2.msra.mxu1 %v489_v48  ;;  %v221_v47 = vld [vmem:[%s2342_s10 + $0x160] sm:$0xff]  ;;  %v223_v48 = vld [vmem:[%s2342_s10 + $0x170] sm:$0xff] }
  0x3c   : > { %552 = vmatprep.subr.mxu0 %v2067_v2  ;;  %937 = vmatprep.subr.mxu1 %v2067_v2 }
  0x3d   : > { %553 = vmatpush2.msra.mxu0 %v456_v49  ;;  %938 = vmatpush2.msra.mxu1 %v488_v50  ;;  %v226_v49 = vld [vmem:[%s2342_s10 + $0x188] sm:$0xff]  ;;  %v228_v50 = vld [vmem:[%s2342_s10 + $0x198] sm:$0xff] }
  0x3e   : > { %554 = vmatprep.subr.mxu0 %v2067_v2  ;;  %939 = vmatprep.subr.mxu1 %v2067_v2 }
  0x3f   : > { %555 = vmatpush2.msra.mxu0 %v455_v51  ;;  %940 = vmatpush2.msra.mxu1 %v487_v52  ;;  %v225_v51 = vld [vmem:[%s2342_s10 + $0x180] sm:$0xff]  ;;  %v227_v52 = vld [vmem:[%s2342_s10 + $0x190] sm:$0xff] }
  0x40   : > { %556 = vmatprep.subr.mxu0 %v2067_v2  ;;  %941 = vmatprep.subr.mxu1 %v2067_v2 }
  0x41   : > { %557 = vmatpush2.msra.mxu0 %v454_v53  ;;  %942 = vmatpush2.msra.mxu1 %v486_v54  ;;  %v230_v53 = vld [vmem:[%s2342_s10 + $0x1a8] sm:$0xff]  ;;  %v232_v54 = vld [vmem:[%s2342_s10 + $0x1b8] sm:$0xff] }
  0x42   : > { %558 = vmatprep.subr.mxu0 %v2067_v2  ;;  %943 = vmatprep.subr.mxu1 %v2067_v2 }
  0x43   : > { %559 = vmatpush2.msra.mxu0 %v453_v55  ;;  %944 = vmatpush2.msra.mxu1 %v485_v56  ;;  %v229_v55 = vld [vmem:[%s2342_s10 + $0x1a0] sm:$0xff]  ;;  %v231_v56 = vld [vmem:[%s2342_s10 + $0x1b0] sm:$0xff] }
  0x44   : > { %560 = vmatprep.subr.mxu0 %v2067_v2  ;;  %945 = vmatprep.subr.mxu1 %v2067_v2 }
  0x45   : > { %561 = vmatpush2.msra.mxu0 %v452_v57  ;;  %946 = vmatpush2.msra.mxu1 %v484_v58  ;;  %v234_v57 = vld [vmem:[%s2342_s10 + $0x1c8] sm:$0xff]  ;;  %v236_v58 = vld [vmem:[%s2342_s10 + $0x1d8] sm:$0xff] }
  0x46   : > { %562 = vmatprep.subr.mxu0 %v2067_v2  ;;  %947 = vmatprep.subr.mxu1 %v2067_v2 }
  0x47   : > { %563 = vmatpush2.msra.mxu0 %v451_v59  ;;  %948 = vmatpush2.msra.mxu1 %v483_v60  ;;  %v233_v59 = vld [vmem:[%s2342_s10 + $0x1c0] sm:$0xff]  ;;  %v235_v60 = vld [vmem:[%s2342_s10 + $0x1d0] sm:$0xff] }
  0x48   : > { %564 = vmatprep.subr.mxu0 %v2067_v2  ;;  %949 = vmatprep.subr.mxu1 %v2067_v2 }
  0x49   : > { %565 = vmatpush2.msra.mxu0 %v450_v61  ;;  %950 = vmatpush2.msra.mxu1 %v482_v62  ;;  %v238_v61 = vld [vmem:[%s2342_s10 + $0x1e8] sm:$0xff]  ;;  %v240_v62 = vld [vmem:[%s2342_s10 + $0x1f8] sm:$0xff] }
  0x4a   : > { %566 = vmatprep.subr.mxu0 %v2067_v2  ;;  %951 = vmatprep.subr.mxu1 %v2067_v2  ;;  %v183_v2 = vld [vmem:[%s2342_s10 + $0x30] sm:$0xff] }
  0x4b   : > { %567 = vmatpush2.msra.mxu0 %v449_v63  ;;  %568 = vmatprep.mubr.f32.mxu0 %v178_v0  ;;  %v237_v63 = vld [vmem:[%s2342_s10 + $0x1e0] sm:$0xff]  ;;  %v239_v0 = vld [vmem:[%s2342_s10 + $0x1f0] sm:$0xff] }
  0x4c   : > { %952 = vmatpush2.msra.mxu1 %v481_v1  ;;  %953 = vmatprep.mubr.f32.mxu1 %v180_v3  ;;  %v242_v1 = vld [vmem:[%s2342_s10 + $0x208] sm:$0xff]  ;;  %v244_v3 = vld [vmem:[%s2342_s10 + $0x218] sm:$0xff] }
  0x4d   : > { %569 = vmatmul.mubr.f32.vlgmr.msra.gmra.mxu0 %v177_v4  ;;  %954 = vmatmul.mubr.f32.vlgmr.msra.gmra.mxu1 %v179_v5  ;;  %v241_v4 = vld [vmem:[%s2342_s10 + $0x200] sm:$0xff]  ;;  %v243_v5 = vld [vmem:[%s2342_s10 + $0x210] sm:$0xff] }
  0x4e   : > { %573 = vmatprep.mubr.f32.mxu0 %v182_v6  ;;  %958 = vmatprep.mubr.f32.mxu1 %v184_v7  ;;  %v246_v6 = vld [vmem:[%s2342_s10 + $0x228] sm:$0xff]  ;;  %v248_v7 = vld [vmem:[%s2342_s10 + $0x238] sm:$0xff] }
  0x51   : > { %574 = vmatmul.mubr.f32.gmra.mxu0 %v181_v8  ;;  %959 = vmatmul.mubr.f32.gmra.mxu1 %v183_v2  ;;  %v245_v8 = vld [vmem:[%s2342_s10 + $0x220] sm:$0xff]  ;;  %v247_v2 = vld [vmem:[%s2342_s10 + $0x230] sm:$0xff] }
  0x52   : > { %578 = vmatprep.mubr.f32.mxu0 %v186_v9  ;;  %963 = vmatprep.mubr.f32.mxu1 %v188_v10  ;;  %v250_v9 = vld [vmem:[%s2342_s10 + $0x248] sm:$0xff]  ;;  %v252_v10 = vld [vmem:[%s2342_s10 + $0x258] sm:$0xff] }
  0x55   : > { %579 = vmatmul.mubr.f32.gmra.mxu0 %v185_v11  ;;  %964 = vmatmul.mubr.f32.gmra.mxu1 %v187_v12  ;;  %v249_v11 = vld [vmem:[%s2342_s10 + $0x240] sm:$0xff]  ;;  %v251_v12 = vld [vmem:[%s2342_s10 + $0x250] sm:$0xff] }
  0x56   : > { %583 = vmatprep.mubr.f32.mxu0 %v190_v13  ;;  %968 = vmatprep.mubr.f32.mxu1 %v192_v14  ;;  %v254_v13 = vld [vmem:[%s2342_s10 + $0x268] sm:$0xff]  ;;  %v256_v14 = vld [vmem:[%s2342_s10 + $0x278] sm:$0xff] }
  0x59   : > { %584 = vmatmul.mubr.f32.gmra.mxu0 %v189_v15  ;;  %969 = vmatmul.mubr.f32.gmra.mxu1 %v191_v16  ;;  %v253_v15 = vld [vmem:[%s2342_s10 + $0x260] sm:$0xff]  ;;  %v255_v16 = vld [vmem:[%s2342_s10 + $0x270] sm:$0xff] }
  0x5a   : > { %588 = vmatprep.mubr.f32.mxu0 %v194_v17  ;;  %973 = vmatprep.mubr.f32.mxu1 %v196_v18  ;;  %v258_v17 = vld [vmem:[%s2342_s10 + $0x288] sm:$0xff]  ;;  %v260_v18 = vld [vmem:[%s2342_s10 + $0x298] sm:$0xff] }
  0x5d   : > { %589 = vmatmul.mubr.f32.gmra.mxu0 %v193_v19  ;;  %974 = vmatmul.mubr.f32.gmra.mxu1 %v195_v20  ;;  %v257_v19 = vld [vmem:[%s2342_s10 + $0x280] sm:$0xff]  ;;  %v259_v20 = vld [vmem:[%s2342_s10 + $0x290] sm:$0xff] }
  0x5e   : > { %593 = vmatprep.mubr.f32.mxu0 %v198_v21  ;;  %978 = vmatprep.mubr.f32.mxu1 %v200_v22  ;;  %v262_v21 = vld [vmem:[%s2342_s10 + $0x2a8] sm:$0xff]  ;;  %v264_v22 = vld [vmem:[%s2342_s10 + $0x2b8] sm:$0xff] }
  0x61   : > { %594 = vmatmul.mubr.f32.gmra.mxu0 %v197_v23  ;;  %979 = vmatmul.mubr.f32.gmra.mxu1 %v199_v24  ;;  %v261_v23 = vld [vmem:[%s2342_s10 + $0x2a0] sm:$0xff]  ;;  %v263_v24 = vld [vmem:[%s2342_s10 + $0x2b0] sm:$0xff] }
  0x62   : > { %598 = vmatprep.mubr.f32.mxu0 %v202_v25  ;;  %983 = vmatprep.mubr.f32.mxu1 %v204_v26  ;;  %v266_v25 = vld [vmem:[%s2342_s10 + $0x2c8] sm:$0xff]  ;;  %v268_v26 = vld [vmem:[%s2342_s10 + $0x2d8] sm:$0xff] }
  0x65   : > { %599 = vmatmul.mubr.f32.gmra.mxu0 %v201_v27  ;;  %984 = vmatmul.mubr.f32.gmra.mxu1 %v203_v28  ;;  %v265_v27 = vld [vmem:[%s2342_s10 + $0x2c0] sm:$0xff]  ;;  %v267_v28 = vld [vmem:[%s2342_s10 + $0x2d0] sm:$0xff] }
  0x66   : > { %603 = vmatprep.mubr.f32.mxu0 %v206_v29  ;;  %988 = vmatprep.mubr.f32.mxu1 %v208_v30  ;;  %v270_v29 = vld [vmem:[%s2342_s10 + $0x2e8] sm:$0xff]  ;;  %v272_v30 = vld [vmem:[%s2342_s10 + $0x2f8] sm:$0xff] }
  0x69   : > { %604 = vmatmul.mubr.f32.gmra.mxu0 %v205_v31  ;;  %989 = vmatmul.mubr.f32.gmra.mxu1 %v207_v32  ;;  %v269_v31 = vld [vmem:[%s2342_s10 + $0x2e0] sm:$0xff]  ;;  %v271_v32 = vld [vmem:[%s2342_s10 + $0x2f0] sm:$0xff] }
  0x6a   : > { %608 = vmatprep.mubr.f32.mxu0 %v210_v33  ;;  %993 = vmatprep.mubr.f32.mxu1 %v212_v34  ;;  %v274_v33 = vld [vmem:[%s2342_s10 + $0x308] sm:$0xff]  ;;  %v276_v34 = vld [vmem:[%s2342_s10 + $0x318] sm:$0xff] }
  0x6d   : > { %609 = vmatmul.mubr.f32.gmra.mxu0 %v209_v35  ;;  %994 = vmatmul.mubr.f32.gmra.mxu1 %v211_v36  ;;  %v273_v35 = vld [vmem:[%s2342_s10 + $0x300] sm:$0xff]  ;;  %v275_v36 = vld [vmem:[%s2342_s10 + $0x310] sm:$0xff] }
  0x6e   : > { %613 = vmatprep.mubr.f32.mxu0 %v214_v37  ;;  %998 = vmatprep.mubr.f32.mxu1 %v216_v38  ;;  %v278_v37 = vld [vmem:[%s2342_s10 + $0x328] sm:$0xff]  ;;  %v280_v38 = vld [vmem:[%s2342_s10 + $0x338] sm:$0xff] }
  0x71   : > { %614 = vmatmul.mubr.f32.gmra.mxu0 %v213_v39  ;;  %999 = vmatmul.mubr.f32.gmra.mxu1 %v215_v40  ;;  %v277_v39 = vld [vmem:[%s2342_s10 + $0x320] sm:$0xff]  ;;  %v279_v40 = vld [vmem:[%s2342_s10 + $0x330] sm:$0xff] }
  0x72   : > { %618 = vmatprep.mubr.f32.mxu0 %v218_v41  ;;  %1003 = vmatprep.mubr.f32.mxu1 %v220_v42  ;;  %v282_v41 = vld [vmem:[%s2342_s10 + $0x348] sm:$0xff]  ;;  %v284_v42 = vld [vmem:[%s2342_s10 + $0x358] sm:$0xff] }
  0x75   : > { %619 = vmatmul.mubr.f32.gmra.mxu0 %v217_v43  ;;  %1004 = vmatmul.mubr.f32.gmra.mxu1 %v219_v44  ;;  %v281_v43 = vld [vmem:[%s2342_s10 + $0x340] sm:$0xff]  ;;  %v283_v44 = vld [vmem:[%s2342_s10 + $0x350] sm:$0xff] }
  0x76   : > { %623 = vmatprep.mubr.f32.mxu0 %v222_v45  ;;  %1008 = vmatprep.mubr.f32.mxu1 %v224_v46  ;;  %v286_v45 = vld [vmem:[%s2342_s10 + $0x368] sm:$0xff]  ;;  %v288_v46 = vld [vmem:[%s2342_s10 + $0x378] sm:$0xff] }
  0x79   : > { %624 = vmatmul.mubr.f32.gmra.mxu0 %v221_v47  ;;  %1009 = vmatmul.mubr.f32.gmra.mxu1 %v223_v48  ;;  %v285_v47 = vld [vmem:[%s2342_s10 + $0x360] sm:$0xff]  ;;  %v287_v48 = vld [vmem:[%s2342_s10 + $0x370] sm:$0xff] }
  0x7a   : > { %628 = vmatprep.mubr.f32.mxu0 %v226_v49  ;;  %1013 = vmatprep.mubr.f32.mxu1 %v228_v50  ;;  %v290_v49 = vld [vmem:[%s2342_s10 + $0x388] sm:$0xff]  ;;  %v292_v50 = vld [vmem:[%s2342_s10 + $0x398] sm:$0xff] }
  0x7d   : > { %629 = vmatmul.mubr.f32.gmra.mxu0 %v225_v51  ;;  %1014 = vmatmul.mubr.f32.gmra.mxu1 %v227_v52  ;;  %v289_v51 = vld [vmem:[%s2342_s10 + $0x380] sm:$0xff]  ;;  %v291_v52 = vld [vmem:[%s2342_s10 + $0x390] sm:$0xff] }
  0x7e   : > { %633 = vmatprep.mubr.f32.mxu0 %v230_v53  ;;  %1018 = vmatprep.mubr.f32.mxu1 %v232_v54  ;;  %v294_v53 = vld [vmem:[%s2342_s10 + $0x3a8] sm:$0xff]  ;;  %v296_v54 = vld [vmem:[%s2342_s10 + $0x3b8] sm:$0xff] }
  0x81   : > { %634 = vmatmul.mubr.f32.gmra.mxu0 %v229_v55  ;;  %1019 = vmatmul.mubr.f32.gmra.mxu1 %v231_v56  ;;  %v293_v55 = vld [vmem:[%s2342_s10 + $0x3a0] sm:$0xff]  ;;  %v295_v56 = vld [vmem:[%s2342_s10 + $0x3b0] sm:$0xff] }
  0x82   : > { %638 = vmatprep.mubr.f32.mxu0 %v234_v57  ;;  %1023 = vmatprep.mubr.f32.mxu1 %v236_v58  ;;  %v298_v57 = vld [vmem:[%s2342_s10 + $0x3c8] sm:$0xff]  ;;  %v300_v58 = vld [vmem:[%s2342_s10 + $0x3d8] sm:$0xff] }
  0x85   : > { %639 = vmatmul.mubr.f32.gmra.mxu0 %v233_v59  ;;  %1024 = vmatmul.mubr.f32.gmra.mxu1 %v235_v60  ;;  %v297_v59 = vld [vmem:[%s2342_s10 + $0x3c0] sm:$0xff]  ;;  %v299_v60 = vld [vmem:[%s2342_s10 + $0x3d0] sm:$0xff] }
  0x86   : > { %643 = vmatprep.mubr.f32.mxu0 %v238_v61  ;;  %1028 = vmatprep.mubr.f32.mxu1 %v240_v62  ;;  %v302_v61 = vld [vmem:[%s2342_s10 + $0x3e8] sm:$0xff]  ;;  %v304_v62 = vld [vmem:[%s2342_s10 + $0x3f8] sm:$0xff] }
  0x89   : > { %644 = vmatmul.mubr.f32.gmra.mxu0 %v237_v63  ;;  %1029 = vmatmul.mubr.f32.gmra.mxu1 %v239_v0  ;;  %v301_v63 = vld [vmem:[%s2342_s10 + $0x3e0] sm:$0xff]  ;;  %v303_v0 = vld [vmem:[%s2342_s10 + $0x3f0] sm:$0xff] }
  0x8a   : > { %648 = vmatprep.mubr.f32.mxu0 %v242_v1  ;;  %1033 = vmatprep.mubr.f32.mxu1 %v244_v3  ;;  %v306_v1 = vld [vmem:[%s2342_s10 + $0x408] sm:$0xff]  ;;  %v308_v3 = vld [vmem:[%s2342_s10 + $0x418] sm:$0xff] }
  0x8d   : > { %649 = vmatmul.mubr.f32.gmra.mxu0 %v241_v4  ;;  %1034 = vmatmul.mubr.f32.gmra.mxu1 %v243_v5  ;;  %v305_v4 = vld [vmem:[%s2342_s10 + $0x400] sm:$0xff]  ;;  %v307_v5 = vld [vmem:[%s2342_s10 + $0x410] sm:$0xff] }
  0x8e   : > { %653 = vmatprep.mubr.f32.mxu0 %v246_v6  ;;  %1038 = vmatprep.mubr.f32.mxu1 %v248_v7  ;;  %v310_v6 = vld [vmem:[%s2342_s10 + $0x428] sm:$0xff]  ;;  %v312_v7 = vld [vmem:[%s2342_s10 + $0x438] sm:$0xff] }
  0x91   : > { %654 = vmatmul.mubr.f32.gmra.mxu0 %v245_v8  ;;  %1039 = vmatmul.mubr.f32.gmra.mxu1 %v247_v2  ;;  %v309_v8 = vld [vmem:[%s2342_s10 + $0x420] sm:$0xff]  ;;  %v311_v2 = vld [vmem:[%s2342_s10 + $0x430] sm:$0xff] }
  0x92   : > { %658 = vmatprep.mubr.f32.mxu0 %v250_v9  ;;  %1043 = vmatprep.mubr.f32.mxu1 %v252_v10  ;;  %v314_v9 = vld [vmem:[%s2342_s10 + $0x448] sm:$0xff]  ;;  %v316_v10 = vld [vmem:[%s2342_s10 + $0x458] sm:$0xff] }
  0x95   : > { %659 = vmatmul.mubr.f32.gmra.mxu0 %v249_v11  ;;  %1044 = vmatmul.mubr.f32.gmra.mxu1 %v251_v12  ;;  %v313_v11 = vld [vmem:[%s2342_s10 + $0x440] sm:$0xff]  ;;  %v315_v12 = vld [vmem:[%s2342_s10 + $0x450] sm:$0xff] }
  0x96   : > { %663 = vmatprep.mubr.f32.mxu0 %v254_v13  ;;  %1048 = vmatprep.mubr.f32.mxu1 %v256_v14  ;;  %v318_v13 = vld [vmem:[%s2342_s10 + $0x468] sm:$0xff]  ;;  %v320_v14 = vld [vmem:[%s2342_s10 + $0x478] sm:$0xff] }
  0x99   : > { %664 = vmatmul.mubr.f32.gmra.mxu0 %v253_v15  ;;  %1049 = vmatmul.mubr.f32.gmra.mxu1 %v255_v16  ;;  %v317_v15 = vld [vmem:[%s2342_s10 + $0x460] sm:$0xff]  ;;  %v319_v16 = vld [vmem:[%s2342_s10 + $0x470] sm:$0xff] }
  0x9a   : > { %668 = vmatprep.mubr.f32.mxu0 %v258_v17  ;;  %1053 = vmatprep.mubr.f32.mxu1 %v260_v18  ;;  %v322_v17 = vld [vmem:[%s2342_s10 + $0x488] sm:$0xff]  ;;  %v324_v18 = vld [vmem:[%s2342_s10 + $0x498] sm:$0xff] }
  0x9d   : > { %669 = vmatmul.mubr.f32.gmra.mxu0 %v257_v19  ;;  %1054 = vmatmul.mubr.f32.gmra.mxu1 %v259_v20  ;;  %v321_v19 = vld [vmem:[%s2342_s10 + $0x480] sm:$0xff]  ;;  %v323_v20 = vld [vmem:[%s2342_s10 + $0x490] sm:$0xff] }
  0x9e   : > { %673 = vmatprep.mubr.f32.mxu0 %v262_v21  ;;  %1058 = vmatprep.mubr.f32.mxu1 %v264_v22  ;;  %v326_v21 = vld [vmem:[%s2342_s10 + $0x4a8] sm:$0xff]  ;;  %v328_v22 = vld [vmem:[%s2342_s10 + $0x4b8] sm:$0xff] }
  0xa1   : > { %674 = vmatmul.mubr.f32.gmra.mxu0 %v261_v23  ;;  %1059 = vmatmul.mubr.f32.gmra.mxu1 %v263_v24  ;;  %v325_v23 = vld [vmem:[%s2342_s10 + $0x4a0] sm:$0xff]  ;;  %v327_v24 = vld [vmem:[%s2342_s10 + $0x4b0] sm:$0xff] }
  0xa2   : > { %678 = vmatprep.mubr.f32.mxu0 %v266_v25  ;;  %1063 = vmatprep.mubr.f32.mxu1 %v268_v26  ;;  %v330_v25 = vld [vmem:[%s2342_s10 + $0x4c8] sm:$0xff]  ;;  %v332_v26 = vld [vmem:[%s2342_s10 + $0x4d8] sm:$0xff] }
  0xa5   : > { %679 = vmatmul.mubr.f32.gmra.mxu0 %v265_v27  ;;  %1064 = vmatmul.mubr.f32.gmra.mxu1 %v267_v28  ;;  %v329_v27 = vld [vmem:[%s2342_s10 + $0x4c0] sm:$0xff]  ;;  %v331_v28 = vld [vmem:[%s2342_s10 + $0x4d0] sm:$0xff] }
  0xa6   : > { %683 = vmatprep.mubr.f32.mxu0 %v270_v29  ;;  %1068 = vmatprep.mubr.f32.mxu1 %v272_v30  ;;  %v334_v29 = vld [vmem:[%s2342_s10 + $0x4e8] sm:$0xff]  ;;  %v336_v30 = vld [vmem:[%s2342_s10 + $0x4f8] sm:$0xff] }
  0xa9   : > { %684 = vmatmul.mubr.f32.gmra.mxu0 %v269_v31  ;;  %1069 = vmatmul.mubr.f32.gmra.mxu1 %v271_v32  ;;  %v333_v31 = vld [vmem:[%s2342_s10 + $0x4e0] sm:$0xff]  ;;  %v335_v32 = vld [vmem:[%s2342_s10 + $0x4f0] sm:$0xff] }
  0xaa   : > { %688 = vmatprep.mubr.f32.mxu0 %v274_v33  ;;  %1073 = vmatprep.mubr.f32.mxu1 %v276_v34  ;;  %v338_v33 = vld [vmem:[%s2342_s10 + $0x508] sm:$0xff]  ;;  %v340_v34 = vld [vmem:[%s2342_s10 + $0x518] sm:$0xff] }
  0xad   : > { %689 = vmatmul.mubr.f32.gmra.mxu0 %v273_v35  ;;  %1074 = vmatmul.mubr.f32.gmra.mxu1 %v275_v36  ;;  %v337_v35 = vld [vmem:[%s2342_s10 + $0x500] sm:$0xff]  ;;  %v339_v36 = vld [vmem:[%s2342_s10 + $0x510] sm:$0xff] }
  0xae   : > { %693 = vmatprep.mubr.f32.mxu0 %v278_v37  ;;  %1078 = vmatprep.mubr.f32.mxu1 %v280_v38  ;;  %v342_v37 = vld [vmem:[%s2342_s10 + $0x528] sm:$0xff]  ;;  %v344_v38 = vld [vmem:[%s2342_s10 + $0x538] sm:$0xff] }
  0xb1   : > { %694 = vmatmul.mubr.f32.gmra.mxu0 %v277_v39  ;;  %1079 = vmatmul.mubr.f32.gmra.mxu1 %v279_v40  ;;  %v341_v39 = vld [vmem:[%s2342_s10 + $0x520] sm:$0xff]  ;;  %v343_v40 = vld [vmem:[%s2342_s10 + $0x530] sm:$0xff] }
  0xb2   : > { %698 = vmatprep.mubr.f32.mxu0 %v282_v41  ;;  %1083 = vmatprep.mubr.f32.mxu1 %v284_v42  ;;  %v346_v41 = vld [vmem:[%s2342_s10 + $0x548] sm:$0xff]  ;;  %v348_v42 = vld [vmem:[%s2342_s10 + $0x558] sm:$0xff] }
  0xb5   : > { %699 = vmatmul.mubr.f32.gmra.mxu0 %v281_v43  ;;  %1084 = vmatmul.mubr.f32.gmra.mxu1 %v283_v44  ;;  %v345_v43 = vld [vmem:[%s2342_s10 + $0x540] sm:$0xff]  ;;  %v347_v44 = vld [vmem:[%s2342_s10 + $0x550] sm:$0xff] }
  0xb6   : > { %703 = vmatprep.mubr.f32.mxu0 %v286_v45  ;;  %1088 = vmatprep.mubr.f32.mxu1 %v288_v46  ;;  %v350_v45 = vld [vmem:[%s2342_s10 + $0x568] sm:$0xff]  ;;  %v352_v46 = vld [vmem:[%s2342_s10 + $0x578] sm:$0xff] }
  0xb9   : > { %704 = vmatmul.mubr.f32.gmra.mxu0 %v285_v47  ;;  %1089 = vmatmul.mubr.f32.gmra.mxu1 %v287_v48  ;;  %v349_v47 = vld [vmem:[%s2342_s10 + $0x560] sm:$0xff]  ;;  %v351_v48 = vld [vmem:[%s2342_s10 + $0x570] sm:$0xff] }
  0xba   : > { %708 = vmatprep.mubr.f32.mxu0 %v290_v49  ;;  %1093 = vmatprep.mubr.f32.mxu1 %v292_v50  ;;  %v354_v49 = vld [vmem:[%s2342_s10 + $0x588] sm:$0xff]  ;;  %v356_v50 = vld [vmem:[%s2342_s10 + $0x598] sm:$0xff] }
  0xbd   : > { %709 = vmatmul.mubr.f32.gmra.mxu0 %v289_v51  ;;  %1094 = vmatmul.mubr.f32.gmra.mxu1 %v291_v52  ;;  %v353_v51 = vld [vmem:[%s2342_s10 + $0x580] sm:$0xff]  ;;  %v355_v52 = vld [vmem:[%s2342_s10 + $0x590] sm:$0xff] }
  0xbe   : > { %713 = vmatprep.mubr.f32.mxu0 %v294_v53  ;;  %1098 = vmatprep.mubr.f32.mxu1 %v296_v54  ;;  %v358_v53 = vld [vmem:[%s2342_s10 + $0x5a8] sm:$0xff]  ;;  %v360_v54 = vld [vmem:[%s2342_s10 + $0x5b8] sm:$0xff] }
  0xc1   : > { %714 = vmatmul.mubr.f32.gmra.mxu0 %v293_v55  ;;  %1099 = vmatmul.mubr.f32.gmra.mxu1 %v295_v56  ;;  %v357_v55 = vld [vmem:[%s2342_s10 + $0x5a0] sm:$0xff]  ;;  %v359_v56 = vld [vmem:[%s2342_s10 + $0x5b0] sm:$0xff] }
  0xc2   : > { %718 = vmatprep.mubr.f32.mxu0 %v298_v57  ;;  %1103 = vmatprep.mubr.f32.mxu1 %v300_v58  ;;  %v362_v57 = vld [vmem:[%s2342_s10 + $0x5c8] sm:$0xff]  ;;  %v364_v58 = vld [vmem:[%s2342_s10 + $0x5d8] sm:$0xff] }
  0xc5   : > { %719 = vmatmul.mubr.f32.gmra.mxu0 %v297_v59  ;;  %1104 = vmatmul.mubr.f32.gmra.mxu1 %v299_v60  ;;  %v361_v59 = vld [vmem:[%s2342_s10 + $0x5c0] sm:$0xff]  ;;  %v363_v60 = vld [vmem:[%s2342_s10 + $0x5d0] sm:$0xff] }
  0xc6   : > { %723 = vmatprep.mubr.f32.mxu0 %v302_v61  ;;  %1108 = vmatprep.mubr.f32.mxu1 %v304_v62  ;;  %v366_v61 = vld [vmem:[%s2342_s10 + $0x5e8] sm:$0xff]  ;;  %v368_v62 = vld [vmem:[%s2342_s10 + $0x5f8] sm:$0xff] }
  0xc9   : > { %724 = vmatmul.mubr.f32.gmra.mxu0 %v301_v63  ;;  %1109 = vmatmul.mubr.f32.gmra.mxu1 %v303_v0  ;;  %v365_v63 = vld [vmem:[%s2342_s10 + $0x5e0] sm:$0xff]  ;;  %v367_v0 = vld [vmem:[%s2342_s10 + $0x5f0] sm:$0xff] }
  0xca   : > { %728 = vmatprep.mubr.f32.mxu0 %v306_v1  ;;  %1113 = vmatprep.mubr.f32.mxu1 %v308_v3  ;;  %v370_v1 = vld [vmem:[%s2342_s10 + $0x608] sm:$0xff]  ;;  %v372_v3 = vld [vmem:[%s2342_s10 + $0x618] sm:$0xff] }
  0xcd   : > { %729 = vmatmul.mubr.f32.gmra.mxu0 %v305_v4  ;;  %1114 = vmatmul.mubr.f32.gmra.mxu1 %v307_v5  ;;  %v369_v4 = vld [vmem:[%s2342_s10 + $0x600] sm:$0xff]  ;;  %v371_v5 = vld [vmem:[%s2342_s10 + $0x610] sm:$0xff] }
  0xce   : > { %733 = vmatprep.mubr.f32.mxu0 %v310_v6  ;;  %1118 = vmatprep.mubr.f32.mxu1 %v312_v7  ;;  %v2561_v6 = vld [vmem:[%s2831_s2] ss:$0 sm:$0xff]  ;;  %v374_v7 = vld [vmem:[%s2342_s10 + $0x628] sm:$0xff] }
  0xd1   : > { %734 = vmatmul.mubr.f32.gmra.mxu0 %v309_v8  ;;  %1119 = vmatmul.mubr.f32.gmra.mxu1 %v311_v2  ;;  %v376_v8 = vld [vmem:[%s2342_s10 + $0x638] sm:$0xff] }
  0xd2   : > { %738 = vmatprep.mubr.f32.mxu0 %v314_v9  ;;  %1123 = vmatprep.mubr.f32.mxu1 %v316_v10 }
  0xd5   : > { %739 = vmatmul.mubr.f32.gmra.mxu0 %v313_v11  ;;  %1124 = vmatmul.mubr.f32.gmra.mxu1 %v315_v12  ;;  %v373_v11 = vld [vmem:[%s2342_s10 + $0x620] sm:$0xff]  ;;  %v375_v12 = vld [vmem:[%s2342_s10 + $0x630] sm:$0xff] }
  0xd6   : > { %743 = vmatprep.mubr.f32.mxu0 %v318_v13  ;;  %1128 = vmatprep.mubr.f32.mxu1 %v320_v14 }
  0xd9   : > { %744 = vmatmul.mubr.f32.gmra.mxu0 %v317_v15  ;;  %1129 = vmatmul.mubr.f32.gmra.mxu1 %v319_v16  ;;  %v378_v15 = vld [vmem:[%s2342_s10 + $0x648] sm:$0xff]  ;;  %v380_v16 = vld [vmem:[%s2342_s10 + $0x658] sm:$0xff] }
  0xda   : > { %748 = vmatprep.mubr.f32.mxu0 %v322_v17  ;;  %1133 = vmatprep.mubr.f32.mxu1 %v324_v18 }
  0xdd   : > { %749 = vmatmul.mubr.f32.gmra.mxu0 %v321_v19  ;;  %1134 = vmatmul.mubr.f32.gmra.mxu1 %v323_v20 }
  0xde   : > { %753 = vmatprep.mubr.f32.mxu0 %v326_v21  ;;  %1138 = vmatprep.mubr.f32.mxu1 %v328_v22  ;;  %v377_v22 = vld [vmem:[%s2342_s10 + $0x640] sm:$0xff] }
  0xe1   : > { %754 = vmatmul.mubr.f32.gmra.mxu0 %v325_v23  ;;  %1139 = vmatmul.mubr.f32.gmra.mxu1 %v327_v24  ;;  %v379_v23 = vld [vmem:[%s2342_s10 + $0x650] sm:$0xff] }
  0xe2   : > { %758 = vmatprep.mubr.f32.mxu0 %v330_v25  ;;  %1143 = vmatprep.mubr.f32.mxu1 %v332_v26  ;;  %v382_v26 = vld [vmem:[%s2342_s10 + $0x668] sm:$0xff] }
  0xe5   : > { %759 = vmatmul.mubr.f32.gmra.mxu0 %v329_v27  ;;  %1144 = vmatmul.mubr.f32.gmra.mxu1 %v331_v28  ;;  %v384_v27 = vld [vmem:[%s2342_s10 + $0x678] sm:$0xff] }
  0xe6   : > { %763 = vmatprep.mubr.f32.mxu0 %v334_v29  ;;  %1148 = vmatprep.mubr.f32.mxu1 %v336_v30 }
  0xe9   : > { %764 = vmatmul.mubr.f32.gmra.mxu0 %v333_v31  ;;  %1149 = vmatmul.mubr.f32.gmra.mxu1 %v335_v32 }
  0xea   : > { %768 = vmatprep.mubr.f32.mxu0 %v338_v33  ;;  %1153 = vmatprep.mubr.f32.mxu1 %v340_v34  ;;  %v381_v34 = vld [vmem:[%s2342_s10 + $0x660] sm:$0xff] }
  0xed   : > { %769 = vmatmul.mubr.f32.gmra.mxu0 %v337_v35  ;;  %1154 = vmatmul.mubr.f32.gmra.mxu1 %v339_v36  ;;  %v383_v35 = vld [vmem:[%s2342_s10 + $0x670] sm:$0xff] }
  0xee   : > { %773 = vmatprep.mubr.f32.mxu0 %v342_v37  ;;  %1158 = vmatprep.mubr.f32.mxu1 %v344_v38  ;;  %v386_v38 = vld [vmem:[%s2342_s10 + $0x688] sm:$0xff] }
  0xf1   : > { %774 = vmatmul.mubr.f32.gmra.mxu0 %v341_v39  ;;  %1159 = vmatmul.mubr.f32.gmra.mxu1 %v343_v40  ;;  %v388_v39 = vld [vmem:[%s2342_s10 + $0x698] sm:$0xff] }
  0xf2   : > { %778 = vmatprep.mubr.f32.mxu0 %v346_v41  ;;  %1163 = vmatprep.mubr.f32.mxu1 %v348_v42 }
  0xf5   : > { %779 = vmatmul.mubr.f32.gmra.mxu0 %v345_v43  ;;  %1164 = vmatmul.mubr.f32.gmra.mxu1 %v347_v44 }
  0xf6   : > { %783 = vmatprep.mubr.f32.mxu0 %v350_v45  ;;  %1168 = vmatprep.mubr.f32.mxu1 %v352_v46  ;;  %v385_v46 = vld [vmem:[%s2342_s10 + $0x680] sm:$0xff] }
  0xf9   : > { %784 = vmatmul.mubr.f32.gmra.mxu0 %v349_v47  ;;  %1169 = vmatmul.mubr.f32.gmra.mxu1 %v351_v48  ;;  %v387_v47 = vld [vmem:[%s2342_s10 + $0x690] sm:$0xff] }
  0xfa   : > { %788 = vmatprep.mubr.f32.mxu0 %v354_v49  ;;  %1173 = vmatprep.mubr.f32.mxu1 %v356_v50  ;;  %v390_v50 = vld [vmem:[%s2342_s10 + $0x6a8] sm:$0xff] }
  0xfd   : > { %789 = vmatmul.mubr.f32.gmra.mxu0 %v353_v51  ;;  %1174 = vmatmul.mubr.f32.gmra.mxu1 %v355_v52  ;;  %v392_v51 = vld [vmem:[%s2342_s10 + $0x6b8] sm:$0xff] }
  0xfe   : > { %793 = vmatprep.mubr.f32.mxu0 %v358_v53  ;;  %1178 = vmatprep.mubr.f32.mxu1 %v360_v54 }
 0x101   : > { %794 = vmatmul.mubr.f32.gmra.mxu0 %v357_v55  ;;  %1179 = vmatmul.mubr.f32.gmra.mxu1 %v359_v56 }
 0x102   : > { %798 = vmatprep.mubr.f32.mxu0 %v362_v57  ;;  %1183 = vmatprep.mubr.f32.mxu1 %v364_v58  ;;  %v389_v58 = vld [vmem:[%s2342_s10 + $0x6a0] sm:$0xff] }
 0x105   : > { %799 = vmatmul.mubr.f32.gmra.mxu0 %v361_v59  ;;  %1184 = vmatmul.mubr.f32.gmra.mxu1 %v363_v60  ;;  %v391_v59 = vld [vmem:[%s2342_s10 + $0x6b0] sm:$0xff] }
 0x106   : > { %803 = vmatprep.mubr.f32.mxu0 %v366_v61  ;;  %1188 = vmatprep.mubr.f32.mxu1 %v368_v62  ;;  %v394_v62 = vld [vmem:[%s2342_s10 + $0x6c8] sm:$0xff] }
 0x109   : > { %804 = vmatmul.mubr.f32.gmra.mxu0 %v365_v63  ;;  %1189 = vmatmul.mubr.f32.gmra.mxu1 %v367_v0  ;;  %v396_v63 = vld [vmem:[%s2342_s10 + $0x6d8] sm:$0xff] }
 0x10a   : > { %808 = vmatprep.mubr.f32.mxu0 %v370_v1  ;;  %1193 = vmatprep.mubr.f32.mxu1 %v372_v3 }
 0x10d   : > { %v570_v2 = vpop.f32.mrf.mxu0  ;;  %809 = vmatmul.mubr.f32.gmra.mxu0 %v369_v4  ;;  %v955_v9 = vpop.f32.mrf.mxu1  ;;  %1194 = vmatmul.mubr.f32.gmra.mxu1 %v371_v5 }
 0x10e   : > { %v571_v10 = vadd.f32 %v2561_v6, %v570_v2  ;;  %813 = vmatprep.mubr.f32.mxu0 %v374_v7  ;;  %1198 = vmatprep.mubr.f32.mxu1 %v376_v8  ;;  %v393_v8 = vld [vmem:[%s2342_s10 + $0x6c0] sm:$0xff]  ;;  %v395_v2 = vld [vmem:[%s2342_s10 + $0x6d0] sm:$0xff] }
 0x10f   : > { %v572_v13 = vpop.f32.mrf.mxu0  ;;  %v957_v14 = vpop.f32.mrf.mxu1 }
 0x110   : > { %v956_v17 = vadd.f32 %v955_v9, %v571_v10  ;;  %v400_v13 = vld [vmem:[%s2342_s10 + $0x6f8] sm:$0xff] }
 0x111   : > { %v575_v18 = vpop.f32.mrf.mxu0  ;;  %814 = vmatmul.mubr.f32.gmra.mxu0 %v373_v11  ;;  %v960_v19 = vpop.f32.mrf.mxu1  ;;  %1199 = vmatmul.mubr.f32.gmra.mxu1 %v375_v12  ;;  %v398_v12 = vld [vmem:[%s2342_s10 + $0x6e8] sm:$0xff] }
 0x112   : > { %v1274_v20 = vsub.f32 0.0, %v956_v17  ;;  %v576_v21 = vadd.f32 %v2561_v6, %v575_v18  ;;  %818 = vmatprep.mubr.f32.mxu0 %v378_v15  ;;  %1203 = vmatprep.mubr.f32.mxu1 %v380_v16 }
 0x113   : > { %v577_v24 = vpop.f32.mrf.mxu0  ;;  %v962_v25 = vpop.f32.mrf.mxu1 }
 0x114   : > { %v1338_v28 = vmul.f32 1.442695, %v1274_v20  ;;  %v961_v29 = vadd.f32 %v960_v19, %v576_v21  ;;  %v397_v21 = vld [vmem:[%s2342_s10 + $0x6e0] sm:$0xff] }
 0x115   : > { %v580_v30 = vpop.f32.mrf.mxu0  ;;  %819 = vmatmul.mubr.f32.gmra.mxu0 %v377_v22  ;;  %v965_v31 = vpop.f32.mrf.mxu1  ;;  %1204 = vmatmul.mubr.f32.gmra.mxu1 %v379_v23  ;;  %v399_v22 = vld [vmem:[%s2342_s10 + $0x6f0] sm:$0xff] }
 0x116   : > { %1802 = vpow2.f32 %v1338_v28  ;;  %v1275_v32 = vsub.f32 0.0, %v961_v29  ;;  %v581_v33 = vadd.f32 %v2561_v6, %v580_v30  ;;  %823 = vmatprep.mubr.f32.mxu0 %v382_v26  ;;  %1208 = vmatprep.mubr.f32.mxu1 %v384_v27  ;;  %v402_v26 = vld [vmem:[%s2342_s10 + $0x708] sm:$0xff]  ;;  %v404_v27 = vld [vmem:[%s2342_s10 + $0x718] sm:$0xff] }
 0x117   : > { %v582_v36 = vpop.f32.mrf.mxu0  ;;  %v967_v37 = vpop.f32.mrf.mxu1 }
 0x118   : > { %v1340_v40 = vmul.f32 1.442695, %v1275_v32  ;;  %v966_v41 = vadd.f32 %v965_v31, %v581_v33  ;;  %v403_v36 = vld [vmem:[%s2342_s10 + $0x710] sm:$0xff] }
 0x119   : > { %v585_v42 = vpop.f32.mrf.mxu0  ;;  %824 = vmatmul.mubr.f32.gmra.mxu0 %v381_v34  ;;  %v970_v43 = vpop.f32.mrf.mxu1  ;;  %1209 = vmatmul.mubr.f32.gmra.mxu1 %v383_v35  ;;  %v401_v35 = vld [vmem:[%s2342_s10 + $0x700] sm:$0xff] }
 0x11a   : > { %1804 = vpow2.f32 %v1340_v40  ;;  %v1276_v44 = vsub.f32 0.0, %v966_v41  ;;  %v586_v45 = vadd.f32 %v2561_v6, %v585_v42  ;;  %828 = vmatprep.mubr.f32.mxu0 %v386_v38  ;;  %1213 = vmatprep.mubr.f32.mxu1 %v388_v39  ;;  %v406_v40 = vld [vmem:[%s2342_s10 + $0x728] sm:$0xff]  ;;  %v408_v41 = vld [vmem:[%s2342_s10 + $0x738] sm:$0xff] }
 0x11b   : > { %v587_v48 = vpop.f32.mrf.mxu0  ;;  %v972_v49 = vpop.f32.mrf.mxu1 }
 0x11c   : > { %v1342_v52 = vmul.f32 1.442695, %v1276_v44  ;;  %v971_v53 = vadd.f32 %v970_v43, %v586_v45  ;;  %v405_v49 = vld [vmem:[%s2342_s10 + $0x720] sm:$0xff] }
 0x11d   : > { %v590_v54 = vpop.f32.mrf.mxu0  ;;  %829 = vmatmul.mubr.f32.gmra.mxu0 %v385_v46  ;;  %v975_v55 = vpop.f32.mrf.mxu1  ;;  %1214 = vmatmul.mubr.f32.gmra.mxu1 %v387_v47 }
 0x11e   : > { %1806 = vpow2.f32 %v1342_v52  ;;  %v1277_v56 = vsub.f32 0.0, %v971_v53  ;;  %v591_v57 = vadd.f32 %v2561_v6, %v590_v54  ;;  %833 = vmatprep.mubr.f32.mxu0 %v390_v50  ;;  %1218 = vmatprep.mubr.f32.mxu1 %v392_v51  ;;  %v407_v50 = vld [vmem:[%s2342_s10 + $0x730] sm:$0xff]  ;;  %v410_v54 = vld [vmem:[%s2342_s10 + $0x748] sm:$0xff] }
 0x11f   : > { %v592_v60 = vpop.f32.mrf.mxu0  ;;  %v977_v61 = vpop.f32.mrf.mxu1 }
 0x120   : > { %v1344_v0 = vmul.f32 1.442695, %v1277_v56  ;;  %v976_v1 = vadd.f32 %v975_v55, %v591_v57  ;;  %v412_v55 = vld [vmem:[%s2342_s10 + $0x758] sm:$0xff] }
 0x121   : > { %v595_v3 = vpop.f32.mrf.mxu0  ;;  %834 = vmatmul.mubr.f32.gmra.mxu0 %v389_v58  ;;  %v980_v4 = vpop.f32.mrf.mxu1  ;;  %1219 = vmatmul.mubr.f32.gmra.mxu1 %v391_v59 }
 0x122   : > { %1808 = vpow2.f32 %v1344_v0  ;;  %v1278_v5 = vsub.f32 0.0, %v976_v1  ;;  %v596_v7 = vadd.f32 %v2561_v6, %v595_v3  ;;  %838 = vmatprep.mubr.f32.mxu0 %v394_v62  ;;  %1223 = vmatprep.mubr.f32.mxu1 %v396_v63  ;;  %v409_v63 = vld [vmem:[%s2342_s10 + $0x740] sm:$0xff]  ;;  %v411_v0 = vld [vmem:[%s2342_s10 + $0x750] sm:$0xff] }
 0x123   : > { %v1803_v9 = vpop.eup %1802  ;;  %v597_v10 = vpop.f32.mrf.mxu0 }
 0x124   : > { %v982_v11 = vpop.f32.mrf.mxu1  ;;  %v1466_v14 = vadd.f32 1.0, %v1803_v9  ;;  %v1346_v15 = vmul.f32 1.442695, %v1278_v5  ;;  %v981_v16 = vadd.f32 %v980_v4, %v596_v7  ;;  %v414_v5 = vld [vmem:[%s2342_s10 + $0x768] sm:$0xff]  ;;  %v416_v7 = vld [vmem:[%s2342_s10 + $0x778] sm:$0xff] }
 0x125   : > { %v600_v17 = vpop.f32.mrf.mxu0  ;;  %839 = vmatmul.mubr.f32.gmra.mxu0 %v393_v8  ;;  %1224 = vmatmul.mubr.f32.gmra.mxu1 %v395_v2 }
 0x126   : > { %v985_v18 = vpop.f32.mrf.mxu1  ;;  %1810 = vrcp.f32 %v1466_v14  ;;  %v1279_v19 = vsub.f32 0.0, %v981_v16  ;;  %v601_v20 = vadd.f32 %v2561_v6, %v600_v17  ;;  %843 = vmatprep.mubr.f32.mxu0 %v398_v12  ;;  %1228 = vmatprep.mubr.f32.mxu1 %v400_v13  ;;  %v415_v16 = vld [vmem:[%s2342_s10 + $0x770] sm:$0xff] }
 0x127   : > { %v1805_v23 = vpop.eup %1804  ;;  %1812 = vpow2.f32 %v1346_v15  ;;  %v602_v24 = vpop.f32.mrf.mxu0  ;;  %v413_v15 = vld [vmem:[%s2342_s10 + $0x760] sm:$0xff] }
 0x128   : > { %v987_v25 = vpop.f32.mrf.mxu1  ;;  %v1467_v28 = vadd.f32 1.0, %v1805_v23  ;;  %v1348_v29 = vmul.f32 1.442695, %v1279_v19  ;;  %v986_v30 = vadd.f32 %v985_v18, %v601_v20  ;;  %v418_v20 = vld [vmem:[%s2342_s10 + $0x788] sm:$0xff] }
 0x129   : > { %v605_v31 = vpop.f32.mrf.mxu0  ;;  %844 = vmatmul.mubr.f32.gmra.mxu0 %v397_v21  ;;  %1229 = vmatmul.mubr.f32.gmra.mxu1 %v399_v22  ;;  %v420_v21 = vld [vmem:[%s2342_s10 + $0x798] sm:$0xff] }
 0x12a   : > { %v990_v32 = vpop.f32.mrf.mxu1  ;;  %1814 = vrcp.f32 %v1467_v28  ;;  %v1280_v33 = vsub.f32 0.0, %v986_v30  ;;  %v606_v34 = vadd.f32 %v2561_v6, %v605_v31  ;;  %848 = vmatprep.mubr.f32.mxu0 %v402_v26  ;;  %1233 = vmatprep.mubr.f32.mxu1 %v404_v27  ;;  %v417_v30 = vld [vmem:[%s2342_s10 + $0x780] sm:$0xff]  ;;  %v419_v31 = vld [vmem:[%s2342_s10 + $0x790] sm:$0xff] }
 0x12b   : > { %v1807_v37 = vpop.eup %1806  ;;  %1816 = vpow2.f32 %v1348_v29  ;;  %v607_v38 = vpop.f32.mrf.mxu0 }
 0x12c   : > { %v992_v39 = vpop.f32.mrf.mxu1  ;;  %v1468_v42 = vadd.f32 1.0, %v1807_v37  ;;  %v1350_v43 = vmul.f32 1.442695, %v1280_v33  ;;  %v991_v44 = vadd.f32 %v990_v32, %v606_v34 }
 0x12d   : > { %v610_v45 = vpop.f32.mrf.mxu0  ;;  %849 = vmatmul.mubr.f32.gmra.mxu0 %v401_v35  ;;  %1234 = vmatmul.mubr.f32.gmra.mxu1 %v403_v36  ;;  %v422_v35 = vld [vmem:[%s2342_s10 + $0x7a8] sm:$0xff]  ;;  %v424_v36 = vld [vmem:[%s2342_s10 + $0x7b8] sm:$0xff] }
 0x12e   : > { %v995_v46 = vpop.f32.mrf.mxu1  ;;  %1818 = vrcp.f32 %v1468_v42  ;;  %v1281_v47 = vsub.f32 0.0, %v991_v44  ;;  %v611_v48 = vadd.f32 %v2561_v6, %v610_v45  ;;  %853 = vmatprep.mubr.f32.mxu0 %v406_v40  ;;  %1238 = vmatprep.mubr.f32.mxu1 %v408_v41  ;;  %v421_v45 = vld [vmem:[%s2342_s10 + $0x7a0] sm:$0xff] }
 0x12f   : > { %v1809_v51 = vpop.eup %1808  ;;  %1820 = vpow2.f32 %v1350_v43  ;;  %v612_v52 = vpop.f32.mrf.mxu0 }
 0x130   : > { %v997_v53 = vpop.f32.mrf.mxu1  ;;  %v1469_v56 = vadd.f32 1.0, %v1809_v51  ;;  %v1352_v57 = vmul.f32 1.442695, %v1281_v47  ;;  %v996_v58 = vadd.f32 %v995_v46, %v611_v48  ;;  %v423_v46 = vld [vmem:[%s2342_s10 + $0x7b0] sm:$0xff]  ;;  %v428_v51 = vld [vmem:[%s2342_s10 + $0x7d8] sm:$0xff] }
 0x131   : > { %v615_v59 = vpop.f32.mrf.mxu0  ;;  %854 = vmatmul.mubr.f32.gmra.mxu0 %v405_v49  ;;  %1239 = vmatmul.mubr.f32.gmra.mxu1 %v407_v50  ;;  %v426_v50 = vld [vmem:[%s2342_s10 + $0x7c8] sm:$0xff] }
 0x132   : > { %v1000_v60 = vpop.f32.mrf.mxu1  ;;  %1822 = vrcp.f32 %v1469_v56  ;;  %v1282_v61 = vsub.f32 0.0, %v996_v58  ;;  %v616_v62 = vadd.f32 %v2561_v6, %v615_v59  ;;  %858 = vmatprep.mubr.f32.mxu0 %v410_v54  ;;  %1243 = vmatprep.mubr.f32.mxu1 %v412_v55 }
 0x133   : > { %v1811_v1 = vpop.eup %1810  ;;  %1824 = vpow2.f32 %v1352_v57  ;;  %v617_v3 = vpop.f32.mrf.mxu0 }
 0x134   : > { %v1002_v4 = vpop.f32.mrf.mxu1  ;;  %v1813_v8 = vpop.eup %1812  ;;  %1659 = vst.msk [vmem:[%s2614_s25] sm:$0xff] %vm1658_vm0, %v1811_v1  ;;  %v1354_v2 = vmul.f32 1.442695, %v1282_v61  ;;  %v1001_v9 = vadd.f32 %v1000_v60, %v616_v62  ;;  %v425_v60 = vld [vmem:[%s2342_s10 + $0x7c0] sm:$0xff]  ;;  %v427_v61 = vld [vmem:[%s2342_s10 + $0x7d0] sm:$0xff]  ;;  %v430_v1 = vld [vmem:[%s2342_s10 + $0x7e8] sm:$0xff] }
 0x135   : > { %v1470_v10 = vadd.f32 1.0, %v1813_v8  ;;  %v620_v11 = vpop.f32.mrf.mxu0  ;;  %859 = vmatmul.mubr.f32.gmra.mxu0 %v409_v63  ;;  %1244 = vmatmul.mubr.f32.gmra.mxu1 %v411_v0  ;;  %v432_v3 = vld [vmem:[%s2342_s10 + $0x7f8] sm:$0xff] }
 0x136   : > { %v1005_v12 = vpop.f32.mrf.mxu1  ;;  %1826 = vpow2.f32 %v1354_v2  ;;  %v1283_v13 = vsub.f32 0.0, %v1001_v9  ;;  %v621_v14 = vadd.f32 %v2561_v6, %v620_v11  ;;  %863 = vmatprep.mubr.f32.mxu0 %v414_v5  ;;  %1248 = vmatprep.mubr.f32.mxu1 %v416_v7 }
 0x137   : > { %v1815_v17 = vpop.eup %1814  ;;  %1828 = vrcp.f32 %v1470_v10  ;;  %v622_v18 = vpop.f32.mrf.mxu0 }
 0x138   : > { %v1007_v19 = vpop.f32.mrf.mxu1  ;;  %v1817_v22 = vpop.eup %1816  ;;  %1660 = vst.msk [vmem:[%s2614_s25 + $0x8] sm:$0xff] %vm1658_vm0, %v1815_v17  ;;  %v1356_v23 = vmul.f32 1.442695, %v1283_v13  ;;  %v1006_v24 = vadd.f32 %v1005_v12, %v621_v14  ;;  %v429_v12 = vld [vmem:[%s2342_s10 + $0x7e0] sm:$0xff]  ;;  %v431_v13 = vld [vmem:[%s2342_s10 + $0x7f0] sm:$0xff] }
 0x139   : > { %v1471_v25 = vadd.f32 1.0, %v1817_v22  ;;  %v625_v26 = vpop.f32.mrf.mxu0  ;;  %864 = vmatmul.mubr.f32.gmra.mxu0 %v413_v15  ;;  %1249 = vmatmul.mubr.f32.gmra.mxu1 %v415_v16 }
 0x13a   : > { %v1010_v27 = vpop.f32.mrf.mxu1  ;;  %1830 = vpow2.f32 %v1356_v23  ;;  %v1284_v28 = vsub.f32 0.0, %v1006_v24  ;;  %v626_v29 = vadd.f32 %v2561_v6, %v625_v26  ;;  %868 = vmatprep.mubr.f32.mxu0 %v418_v20  ;;  %1253 = vmatprep.mubr.f32.mxu1 %v420_v21 }
 0x13b   : > { %v1819_v32 = vpop.eup %1818  ;;  %1832 = vrcp.f32 %v1471_v25  ;;  %v627_v33 = vpop.f32.mrf.mxu0 }
 0x13c   : > { %v1012_v34 = vpop.f32.mrf.mxu1  ;;  %v1821_v37 = vpop.eup %1820  ;;  %1661 = vst.msk [vmem:[%s2614_s25 + $0x10] sm:$0xff] %vm1658_vm0, %v1819_v32  ;;  %v1358_v38 = vmul.f32 1.442695, %v1284_v28  ;;  %v1011_v39 = vadd.f32 %v1010_v27, %v626_v29 }
 0x13d   : > { %v1472_v40 = vadd.f32 1.0, %v1821_v37  ;;  %v630_v41 = vpop.f32.mrf.mxu0  ;;  %869 = vmatmul.mubr.f32.gmra.mxu0 %v417_v30  ;;  %1254 = vmatmul.mubr.f32.gmra.mxu1 %v419_v31 }
 0x13e   : > { %v1015_v42 = vpop.f32.mrf.mxu1  ;;  %1834 = vpow2.f32 %v1358_v38  ;;  %v1285_v43 = vsub.f32 0.0, %v1011_v39  ;;  %v631_v44 = vadd.f32 %v2561_v6, %v630_v41  ;;  %873 = vmatprep.mubr.f32.mxu0 %v422_v35  ;;  %1258 = vmatprep.mubr.f32.mxu1 %v424_v36 }
 0x13f   : > { %v1823_v47 = vpop.eup %1822  ;;  %1836 = vrcp.f32 %v1472_v40  ;;  %v632_v48 = vpop.f32.mrf.mxu0 }
 0x140   : > { %v1017_v49 = vpop.f32.mrf.mxu1  ;;  %v1825_v52 = vpop.eup %1824  ;;  %1662 = vst.msk [vmem:[%s2614_s25 + $0x18] sm:$0xff] %vm1658_vm0, %v1823_v47  ;;  %v1360_v53 = vmul.f32 1.442695, %v1285_v43  ;;  %v1016_v54 = vadd.f32 %v1015_v42, %v631_v44 }
 0x141   : > { %v1473_v55 = vadd.f32 1.0, %v1825_v52  ;;  %v635_v56 = vpop.f32.mrf.mxu0  ;;  %874 = vmatmul.mubr.f32.gmra.mxu0 %v421_v45  ;;  %1259 = vmatmul.mubr.f32.gmra.mxu1 %v423_v46 }
 0x142   : > { %v1020_v57 = vpop.f32.mrf.mxu1  ;;  %1838 = vpow2.f32 %v1360_v53  ;;  %v1286_v58 = vsub.f32 0.0, %v1016_v54  ;;  %v636_v59 = vadd.f32 %v2561_v6, %v635_v56  ;;  %878 = vmatprep.mubr.f32.mxu0 %v426_v50  ;;  %1263 = vmatprep.mubr.f32.mxu1 %v428_v51 }
 0x143   : > { %v1827_v62 = vpop.eup %1826  ;;  %1840 = vrcp.f32 %v1473_v55  ;;  %v637_v63 = vpop.f32.mrf.mxu0 }
 0x144   : > { %v1022_v0 = vpop.f32.mrf.mxu1  ;;  %v1829_v4 = vpop.eup %1828  ;;  %v1474_v5 = vadd.f32 1.0, %v1827_v62  ;;  %v1362_v7 = vmul.f32 1.442695, %v1286_v58  ;;  %v1021_v8 = vadd.f32 %v1020_v57, %v636_v59 }
 0x145   : > { %1663 = vst.msk [vmem:[%s2614_s25 + $0x20] sm:$0xff] %vm1658_vm0, %v1829_v4  ;;  %v640_v2 = vpop.f32.mrf.mxu0  ;;  %879 = vmatmul.mubr.f32.gmra.mxu0 %v425_v60  ;;  %1264 = vmatmul.mubr.f32.gmra.mxu1 %v427_v61 }
 0x146   : > { %v1025_v9 = vpop.f32.mrf.mxu1  ;;  %1842 = vrcp.f32 %v1474_v5  ;;  %v1287_v10 = vsub.f32 0.0, %v1021_v8  ;;  %v641_v11 = vadd.f32 %v2561_v6, %v640_v2  ;;  %883 = vmatprep.mubr.f32.mxu0 %v430_v1  ;;  %1268 = vmatprep.mubr.f32.mxu1 %v432_v3 }
 0x147   : > { %v1831_v14 = vpop.eup %1830  ;;  %1844 = vpow2.f32 %v1362_v7  ;;  %v642_v15 = vpop.f32.mrf.mxu0 }
 0x148   : > { %v1027_v16 = vpop.f32.mrf.mxu1  ;;  %v1833_v17 = vpop.eup %1832  ;;  %v1475_v18 = vadd.f32 1.0, %v1831_v14  ;;  %v1364_v19 = vmul.f32 1.442695, %v1287_v10  ;;  %v1026_v20 = vadd.f32 %v1025_v9, %v641_v11 }
 0x149   : > { %1664 = vst.msk [vmem:[%s2614_s25 + $0x28] sm:$0xff] %vm1658_vm0, %v1833_v17  ;;  %v645_v21 = vpop.f32.mrf.mxu0  ;;  %884 = vmatmul.mubr.f32.gmra.mxu0 %v429_v12  ;;  %1269 = vmatmul.mubr.f32.gmra.mxu1 %v431_v13 }
 0x14a   : > { %v1030_v22 = vpop.f32.mrf.mxu1  ;;  %1846 = vrcp.f32 %v1475_v18  ;;  %v1288_v23 = vsub.f32 0.0, %v1026_v20  ;;  %v646_v24 = vadd.f32 %v2561_v6, %v645_v21 }
 0x14b   : > { %v1835_v25 = vpop.eup %1834  ;;  %1848 = vpow2.f32 %v1364_v19  ;;  %v647_v26 = vpop.f32.mrf.mxu0 }
 0x14c   : > { %v1032_v27 = vpop.f32.mrf.mxu1  ;;  %v1837_v28 = vpop.eup %1836  ;;  %v1476_v29 = vadd.f32 1.0, %v1835_v25  ;;  %v1366_v30 = vmul.f32 1.442695, %v1288_v23  ;;  %v1031_v31 = vadd.f32 %v1030_v22, %v646_v24 }
 0x14d   : > { %1665 = vst.msk [vmem:[%s2614_s25 + $0x30] sm:$0xff] %vm1658_vm0, %v1837_v28  ;;  %v650_v32 = vpop.f32.mrf.mxu0 }
 0x14e   : > { %v1035_v33 = vpop.f32.mrf.mxu1  ;;  %1850 = vrcp.f32 %v1476_v29  ;;  %v1289_v34 = vsub.f32 0.0, %v1031_v31  ;;  %v651_v35 = vadd.f32 %v2561_v6, %v650_v32 }
 0x14f   : > { %v1839_v36 = vpop.eup %1838  ;;  %1852 = vpow2.f32 %v1366_v30  ;;  %v652_v37 = vpop.f32.mrf.mxu0 }
 0x150   : > { %v1037_v38 = vpop.f32.mrf.mxu1  ;;  %v1841_v39 = vpop.eup %1840  ;;  %v1477_v40 = vadd.f32 1.0, %v1839_v36  ;;  %v1368_v41 = vmul.f32 1.442695, %v1289_v34  ;;  %v1036_v42 = vadd.f32 %v1035_v33, %v651_v35 }
 0x151   : > { %1666 = vst.msk [vmem:[%s2614_s25 + $0x38] sm:$0xff] %vm1658_vm0, %v1841_v39  ;;  %v655_v43 = vpop.f32.mrf.mxu0 }
 0x152   : > { %v1040_v44 = vpop.f32.mrf.mxu1  ;;  %1854 = vrcp.f32 %v1477_v40  ;;  %v1290_v45 = vsub.f32 0.0, %v1036_v42  ;;  %v656_v46 = vadd.f32 %v2561_v6, %v655_v43 }
 0x153   : > { %v1843_v47 = vpop.eup %1842  ;;  %1856 = vpow2.f32 %v1368_v41  ;;  %v657_v48 = vpop.f32.mrf.mxu0 }
 0x154   : > { %v1042_v49 = vpop.f32.mrf.mxu1  ;;  %v1845_v50 = vpop.eup %1844  ;;  %1667 = vst.msk [vmem:[%s2614_s25 + $0x40] sm:$0xff] %vm1658_vm0, %v1843_v47  ;;  %v1370_v51 = vmul.f32 1.442695, %v1290_v45  ;;  %v1041_v52 = vadd.f32 %v1040_v44, %v656_v46 }
 0x155   : > { %v1478_v53 = vadd.f32 1.0, %v1845_v50  ;;  %v660_v54 = vpop.f32.mrf.mxu0 }
 0x156   : > { %v1045_v55 = vpop.f32.mrf.mxu1  ;;  %1858 = vpow2.f32 %v1370_v51  ;;  %v1291_v56 = vsub.f32 0.0, %v1041_v52  ;;  %v661_v57 = vadd.f32 %v2561_v6, %v660_v54 }
 0x157   : > { %v1847_v58 = vpop.eup %1846  ;;  %1860 = vrcp.f32 %v1478_v53  ;;  %v662_v59 = vpop.f32.mrf.mxu0 }
 0x158   : > { %v1047_v60 = vpop.f32.mrf.mxu1  ;;  %v1849_v61 = vpop.eup %1848  ;;  %1668 = vst.msk [vmem:[%s2614_s25 + $0x48] sm:$0xff] %vm1658_vm0, %v1847_v58  ;;  %v1372_v62 = vmul.f32 1.442695, %v1291_v56  ;;  %v1046_v63 = vadd.f32 %v1045_v55, %v661_v57 }
 0x159   : > { %v1479_v0 = vadd.f32 1.0, %v1849_v61  ;;  %v665_v1 = vpop.f32.mrf.mxu0 }
 0x15a   : > { %v1050_v3 = vpop.f32.mrf.mxu1  ;;  %1862 = vpow2.f32 %v1372_v62  ;;  %v1292_v4 = vsub.f32 0.0, %v1046_v63  ;;  %v666_v5 = vadd.f32 %v2561_v6, %v665_v1 }
 0x15b   : > { %v1851_v7 = vpop.eup %1850  ;;  %1864 = vrcp.f32 %v1479_v0  ;;  %v667_v8 = vpop.f32.mrf.mxu0 }
 0x15c   : > { %v1052_v2 = vpop.f32.mrf.mxu1  ;;  %v1853_v9 = vpop.eup %1852  ;;  %1669 = vst.msk [vmem:[%s2614_s25 + $0x50] sm:$0xff] %vm1658_vm0, %v1851_v7  ;;  %v1374_v10 = vmul.f32 1.442695, %v1292_v4  ;;  %v1051_v11 = vadd.f32 %v1050_v3, %v666_v5 }
 0x15d   : > { %v1480_v12 = vadd.f32 1.0, %v1853_v9  ;;  %v670_v13 = vpop.f32.mrf.mxu0 }
 0x15e   : > { %v1055_v14 = vpop.f32.mrf.mxu1  ;;  %1866 = vpow2.f32 %v1374_v10  ;;  %v1293_v15 = vsub.f32 0.0, %v1051_v11  ;;  %v671_v16 = vadd.f32 %v2561_v6, %v670_v13 }
 0x15f   : > { %v1855_v17 = vpop.eup %1854  ;;  %1868 = vrcp.f32 %v1480_v12  ;;  %v672_v18 = vpop.f32.mrf.mxu0 }
 0x160   : > { %v1057_v19 = vpop.f32.mrf.mxu1  ;;  %v1857_v20 = vpop.eup %1856  ;;  %1670 = vst.msk [vmem:[%s2614_s25 + $0x58] sm:$0xff] %vm1658_vm0, %v1855_v17  ;;  %v1376_v21 = vmul.f32 1.442695, %v1293_v15  ;;  %v1056_v22 = vadd.f32 %v1055_v14, %v671_v16 }
 0x161   : > { %v1481_v23 = vadd.f32 1.0, %v1857_v20  ;;  %v675_v24 = vpop.f32.mrf.mxu0 }
 0x162   : > { %v1060_v25 = vpop.f32.mrf.mxu1  ;;  %1870 = vpow2.f32 %v1376_v21  ;;  %v1294_v26 = vsub.f32 0.0, %v1056_v22  ;;  %v676_v27 = vadd.f32 %v2561_v6, %v675_v24 }
 0x163   : > { %v1859_v28 = vpop.eup %1858  ;;  %1872 = vrcp.f32 %v1481_v23  ;;  %v677_v29 = vpop.f32.mrf.mxu0 }
 0x164   : > { %v1062_v30 = vpop.f32.mrf.mxu1  ;;  %v1861_v31 = vpop.eup %1860  ;;  %v1482_v32 = vadd.f32 1.0, %v1859_v28  ;;  %v1378_v33 = vmul.f32 1.442695, %v1294_v26  ;;  %v1061_v34 = vadd.f32 %v1060_v25, %v676_v27 }
 0x165   : > { %1671 = vst.msk [vmem:[%s2614_s25 + $0x60] sm:$0xff] %vm1658_vm0, %v1861_v31  ;;  %v680_v35 = vpop.f32.mrf.mxu0 }
 0x166   : > { %v1065_v36 = vpop.f32.mrf.mxu1  ;;  %1874 = vrcp.f32 %v1482_v32  ;;  %v1295_v37 = vsub.f32 0.0, %v1061_v34  ;;  %v681_v38 = vadd.f32 %v2561_v6, %v680_v35 }
 0x167   : > { %v1863_v39 = vpop.eup %1862  ;;  %1876 = vpow2.f32 %v1378_v33  ;;  %v682_v40 = vpop.f32.mrf.mxu0 }
 0x168   : > { %v1067_v41 = vpop.f32.mrf.mxu1  ;;  %v1865_v42 = vpop.eup %1864  ;;  %v1483_v43 = vadd.f32 1.0, %v1863_v39  ;;  %v1380_v44 = vmul.f32 1.442695, %v1295_v37  ;;  %v1066_v45 = vadd.f32 %v1065_v36, %v681_v38 }
 0x169   : > { %1672 = vst.msk [vmem:[%s2614_s25 + $0x68] sm:$0xff] %vm1658_vm0, %v1865_v42  ;;  %v685_v46 = vpop.f32.mrf.mxu0 }
 0x16a   : > { %v1070_v47 = vpop.f32.mrf.mxu1  ;;  %1878 = vrcp.f32 %v1483_v43  ;;  %v1296_v48 = vsub.f32 0.0, %v1066_v45  ;;  %v686_v49 = vadd.f32 %v2561_v6, %v685_v46 }
 0x16b   : > { %v1867_v50 = vpop.eup %1866  ;;  %1880 = vpow2.f32 %v1380_v44  ;;  %v687_v51 = vpop.f32.mrf.mxu0 }
 0x16c   : > { %v1072_v52 = vpop.f32.mrf.mxu1  ;;  %v1869_v53 = vpop.eup %1868  ;;  %v1484_v54 = vadd.f32 1.0, %v1867_v50  ;;  %v1382_v55 = vmul.f32 1.442695, %v1296_v48  ;;  %v1071_v56 = vadd.f32 %v1070_v47, %v686_v49 }
 0x16d   : > { %1673 = vst.msk [vmem:[%s2614_s25 + $0x70] sm:$0xff] %vm1658_vm0, %v1869_v53  ;;  %v690_v57 = vpop.f32.mrf.mxu0 }
 0x16e   : > { %v1075_v58 = vpop.f32.mrf.mxu1  ;;  %1882 = vrcp.f32 %v1484_v54  ;;  %v1297_v59 = vsub.f32 0.0, %v1071_v56  ;;  %v691_v60 = vadd.f32 %v2561_v6, %v690_v57 }
 0x16f   : > { %v1871_v61 = vpop.eup %1870  ;;  %1884 = vpow2.f32 %v1382_v55  ;;  %v692_v62 = vpop.f32.mrf.mxu0 }
 0x170   : > { %v1077_v63 = vpop.f32.mrf.mxu1  ;;  %v1873_v0 = vpop.eup %1872  ;;  %v1485_v1 = vadd.f32 1.0, %v1871_v61  ;;  %v1384_v3 = vmul.f32 1.442695, %v1297_v59  ;;  %v1076_v4 = vadd.f32 %v1075_v58, %v691_v60 }
 0x171   : > { %1674 = vst.msk [vmem:[%s2614_s25 + $0x78] sm:$0xff] %vm1658_vm0, %v1873_v0  ;;  %v695_v5 = vpop.f32.mrf.mxu0  ;;  %v2704_v63 = vld [vmem:[%s2831_s2] ss:$0 sm:$0xff] }
 0x172   : > { %v1080_v7 = vpop.f32.mrf.mxu1  ;;  %1886 = vrcp.f32 %v1485_v1  ;;  %v1298_v8 = vsub.f32 0.0, %v1076_v4  ;;  %v696_v2 = vadd.f32 %v2561_v6, %v695_v5 }
 0x173   : > { %v1875_v9 = vpop.eup %1874  ;;  %1888 = vpow2.f32 %v1384_v3  ;;  %v697_v10 = vpop.f32.mrf.mxu0 }
 0x174   : > { %v1082_v11 = vpop.f32.mrf.mxu1  ;;  %v1877_v12 = vpop.eup %1876  ;;  %1675 = vst.msk [vmem:[%s2614_s25 + $0x80] sm:$0xff] %vm1658_vm0, %v1875_v9  ;;  %v1386_v13 = vmul.f32 1.442695, %v1298_v8  ;;  %v1081_v14 = vadd.f32 %v1080_v7, %v696_v2 }
 0x175   : > { %v1486_v15 = vadd.f32 1.0, %v1877_v12  ;;  %v700_v16 = vpop.f32.mrf.mxu0 }
 0x176   : > { %v1085_v17 = vpop.f32.mrf.mxu1  ;;  %1890 = vpow2.f32 %v1386_v13  ;;  %v1299_v18 = vsub.f32 0.0, %v1081_v14  ;;  %v701_v19 = vadd.f32 %v2561_v6, %v700_v16 }
 0x177   : > { %v1879_v20 = vpop.eup %1878  ;;  %1892 = vrcp.f32 %v1486_v15  ;;  %v702_v21 = vpop.f32.mrf.mxu0 }
 0x178   : > { %v1087_v22 = vpop.f32.mrf.mxu1  ;;  %v1881_v23 = vpop.eup %1880  ;;  %1676 = vst.msk [vmem:[%s2614_s25 + $0x88] sm:$0xff] %vm1658_vm0, %v1879_v20  ;;  %v1388_v24 = vmul.f32 1.442695, %v1299_v18  ;;  %v1086_v25 = vadd.f32 %v1085_v17, %v701_v19 }
 0x179   : > { %v1487_v26 = vadd.f32 1.0, %v1881_v23  ;;  %v705_v27 = vpop.f32.mrf.mxu0 }
 0x17a   : > { %v1090_v28 = vpop.f32.mrf.mxu1  ;;  %1894 = vpow2.f32 %v1388_v24  ;;  %v1300_v29 = vsub.f32 0.0, %v1086_v25  ;;  %v706_v30 = vadd.f32 %v2561_v6, %v705_v27 }
 0x17b   : > { %v1883_v31 = vpop.eup %1882  ;;  %1896 = vrcp.f32 %v1487_v26  ;;  %v707_v32 = vpop.f32.mrf.mxu0 }
 0x17c   : > { %v1092_v33 = vpop.f32.mrf.mxu1  ;;  %v1885_v34 = vpop.eup %1884  ;;  %1677 = vst.msk [vmem:[%s2614_s25 + $0x90] sm:$0xff] %vm1658_vm0, %v1883_v31  ;;  %v1390_v35 = vmul.f32 1.442695, %v1300_v29  ;;  %v1091_v36 = vadd.f32 %v1090_v28, %v706_v30 }
 0x17d   : > { %v1488_v37 = vadd.f32 1.0, %v1885_v34  ;;  %v710_v38 = vpop.f32.mrf.mxu0 }
 0x17e   : > { %v1095_v39 = vpop.f32.mrf.mxu1  ;;  %1898 = vpow2.f32 %v1390_v35  ;;  %v1301_v40 = vsub.f32 0.0, %v1091_v36  ;;  %v711_v41 = vadd.f32 %v2561_v6, %v710_v38 }
 0x17f   : > { %v1887_v42 = vpop.eup %1886  ;;  %1900 = vrcp.f32 %v1488_v37  ;;  %v712_v43 = vpop.f32.mrf.mxu0 }
 0x180   : > { %v1097_v44 = vpop.f32.mrf.mxu1  ;;  %v1889_v45 = vpop.eup %1888  ;;  %1678 = vst.msk [vmem:[%s2614_s25 + $0x98] sm:$0xff] %vm1658_vm0, %v1887_v42  ;;  %v1392_v46 = vmul.f32 1.442695, %v1301_v40  ;;  %v1096_v47 = vadd.f32 %v1095_v39, %v711_v41 }
 0x181   : > { %v1489_v48 = vadd.f32 1.0, %v1889_v45  ;;  %v715_v49 = vpop.f32.mrf.mxu0 }
 0x182   : > { %v1100_v50 = vpop.f32.mrf.mxu1  ;;  %1902 = vpow2.f32 %v1392_v46  ;;  %v1302_v51 = vsub.f32 0.0, %v1096_v47  ;;  %v716_v52 = vadd.f32 %v2561_v6, %v715_v49 }
 0x183   : > { %v1891_v53 = vpop.eup %1890  ;;  %1904 = vrcp.f32 %v1489_v48  ;;  %v717_v54 = vpop.f32.mrf.mxu0 }
 0x184   : > { %v1102_v55 = vpop.f32.mrf.mxu1  ;;  %v1893_v56 = vpop.eup %1892  ;;  %v1490_v57 = vadd.f32 1.0, %v1891_v53  ;;  %v1394_v58 = vmul.f32 1.442695, %v1302_v51  ;;  %v1101_v59 = vadd.f32 %v1100_v50, %v716_v52 }
 0x185   : > { %1679 = vst.msk [vmem:[%s2614_s25 + $0xa0] sm:$0xff] %vm1658_vm0, %v1893_v56  ;;  %v720_v60 = vpop.f32.mrf.mxu0 }
 0x186   : > { %v1105_v61 = vpop.f32.mrf.mxu1  ;;  %1906 = vrcp.f32 %v1490_v57  ;;  %v1303_v62 = vsub.f32 0.0, %v1101_v59  ;;  %v721_v6 = vadd.f32 %v2704_v63, %v720_v60 }
 0x187   : > { %v1895_v0 = vpop.eup %1894  ;;  %1908 = vpow2.f32 %v1394_v58  ;;  %v722_v1 = vpop.f32.mrf.mxu0 }
 0x188   : > { %v1107_v3 = vpop.f32.mrf.mxu1  ;;  %v1897_v4 = vpop.eup %1896  ;;  %v1491_v5 = vadd.f32 1.0, %v1895_v0  ;;  %v1396_v7 = vmul.f32 1.442695, %v1303_v62  ;;  %v1106_v8 = vadd.f32 %v1105_v61, %v721_v6 }
 0x189   : > { %1680 = vst.msk [vmem:[%s2614_s25 + $0xa8] sm:$0xff] %vm1658_vm0, %v1897_v4  ;;  %v725_v2 = vpop.f32.mrf.mxu0 }
 0x18a   : > { %v1110_v9 = vpop.f32.mrf.mxu1  ;;  %1910 = vrcp.f32 %v1491_v5  ;;  %v1304_v10 = vsub.f32 0.0, %v1106_v8  ;;  %v726_v11 = vadd.f32 %v2704_v63, %v725_v2 }
 0x18b   : > { %v1899_v12 = vpop.eup %1898  ;;  %1912 = vpow2.f32 %v1396_v7  ;;  %v727_v13 = vpop.f32.mrf.mxu0 }
 0x18c   : > { %v1112_v14 = vpop.f32.mrf.mxu1  ;;  %v1901_v15 = vpop.eup %1900  ;;  %v1492_v16 = vadd.f32 1.0, %v1899_v12  ;;  %v1398_v17 = vmul.f32 1.442695, %v1304_v10  ;;  %v1111_v18 = vadd.f32 %v1110_v9, %v726_v11 }
 0x18d   : > { %1681 = vst.msk [vmem:[%s2614_s25 + $0xb0] sm:$0xff] %vm1658_vm0, %v1901_v15  ;;  %v730_v19 = vpop.f32.mrf.mxu0 }
 0x18e   : > { %v1115_v20 = vpop.f32.mrf.mxu1  ;;  %1914 = vrcp.f32 %v1492_v16  ;;  %v1305_v21 = vsub.f32 0.0, %v1111_v18  ;;  %v731_v22 = vadd.f32 %v2704_v63, %v730_v19 }
 0x18f   : > { %v1903_v23 = vpop.eup %1902  ;;  %1916 = vpow2.f32 %v1398_v17  ;;  %v732_v24 = vpop.f32.mrf.mxu0 }
 0x190   : > { %v1117_v25 = vpop.f32.mrf.mxu1  ;;  %v1905_v26 = vpop.eup %1904  ;;  %v1493_v27 = vadd.f32 1.0, %v1903_v23  ;;  %v1400_v28 = vmul.f32 1.442695, %v1305_v21  ;;  %v1116_v29 = vadd.f32 %v1115_v20, %v731_v22 }
 0x191   : > { %1682 = vst.msk [vmem:[%s2614_s25 + $0xb8] sm:$0xff] %vm1658_vm0, %v1905_v26  ;;  %v735_v30 = vpop.f32.mrf.mxu0 }
 0x192   : > { %v1120_v31 = vpop.f32.mrf.mxu1  ;;  %1918 = vrcp.f32 %v1493_v27  ;;  %v1306_v32 = vsub.f32 0.0, %v1116_v29  ;;  %v736_v33 = vadd.f32 %v2704_v63, %v735_v30 }
 0x193   : > { %v1907_v34 = vpop.eup %1906  ;;  %1920 = vpow2.f32 %v1400_v28  ;;  %v737_v35 = vpop.f32.mrf.mxu0 }
 0x194   : > { %v1122_v36 = vpop.f32.mrf.mxu1  ;;  %v1909_v37 = vpop.eup %1908  ;;  %1683 = vst.msk [vmem:[%s2614_s25 + $0xc0] sm:$0xff] %vm1658_vm0, %v1907_v34  ;;  %v1402_v38 = vmul.f32 1.442695, %v1306_v32  ;;  %v1121_v39 = vadd.f32 %v1120_v31, %v736_v33 }
 0x195   : > { %v1494_v40 = vadd.f32 1.0, %v1909_v37  ;;  %v740_v41 = vpop.f32.mrf.mxu0 }
 0x196   : > { %v1125_v42 = vpop.f32.mrf.mxu1  ;;  %1922 = vpow2.f32 %v1402_v38  ;;  %v1307_v43 = vsub.f32 0.0, %v1121_v39  ;;  %v741_v44 = vadd.f32 %v2704_v63, %v740_v41 }
 0x197   : > { %v1911_v45 = vpop.eup %1910  ;;  %1924 = vrcp.f32 %v1494_v40  ;;  %v742_v46 = vpop.f32.mrf.mxu0 }
 0x198   : > { %v1127_v47 = vpop.f32.mrf.mxu1  ;;  %v1913_v48 = vpop.eup %1912  ;;  %1684 = vst.msk [vmem:[%s2614_s25 + $0xc8] sm:$0xff] %vm1658_vm0, %v1911_v45  ;;  %v1404_v49 = vmul.f32 1.442695, %v1307_v43  ;;  %v1126_v50 = vadd.f32 %v1125_v42, %v741_v44 }
 0x199   : > { %v1495_v51 = vadd.f32 1.0, %v1913_v48  ;;  %v745_v52 = vpop.f32.mrf.mxu0 }
 0x19a   : > { %v1130_v53 = vpop.f32.mrf.mxu1  ;;  %1926 = vpow2.f32 %v1404_v49  ;;  %v1308_v54 = vsub.f32 0.0, %v1126_v50  ;;  %v746_v55 = vadd.f32 %v2704_v63, %v745_v52 }
 0x19b   : > { %v1915_v56 = vpop.eup %1914  ;;  %1928 = vrcp.f32 %v1495_v51  ;;  %v747_v57 = vpop.f32.mrf.mxu0 }
 0x19c   : > { %v1132_v58 = vpop.f32.mrf.mxu1  ;;  %v1917_v59 = vpop.eup %1916  ;;  %1685 = vst.msk [vmem:[%s2614_s25 + $0xd0] sm:$0xff] %vm1658_vm0, %v1915_v56  ;;  %v1406_v60 = vmul.f32 1.442695, %v1308_v54  ;;  %v1131_v61 = vadd.f32 %v1130_v53, %v746_v55 }
 0x19d   : > { %v1496_v62 = vadd.f32 1.0, %v1917_v59  ;;  %v750_v6 = vpop.f32.mrf.mxu0 }
 0x19e   : > { %v1135_v0 = vpop.f32.mrf.mxu1  ;;  %1930 = vpow2.f32 %v1406_v60  ;;  %v1309_v1 = vsub.f32 0.0, %v1131_v61  ;;  %v751_v3 = vadd.f32 %v2704_v63, %v750_v6 }
 0x19f   : > { %v1919_v4 = vpop.eup %1918  ;;  %1932 = vrcp.f32 %v1496_v62  ;;  %v752_v5 = vpop.f32.mrf.mxu0 }
 0x1a0   : > { %v1137_v7 = vpop.f32.mrf.mxu1  ;;  %v1921_v8 = vpop.eup %1920  ;;  %1686 = vst.msk [vmem:[%s2614_s25 + $0xd8] sm:$0xff] %vm1658_vm0, %v1919_v4  ;;  %v1408_v2 = vmul.f32 1.442695, %v1309_v1  ;;  %v1136_v9 = vadd.f32 %v1135_v0, %v751_v3 }
 0x1a1   : > { %v1497_v10 = vadd.f32 1.0, %v1921_v8  ;;  %v755_v11 = vpop.f32.mrf.mxu0 }
 0x1a2   : > { %v1140_v12 = vpop.f32.mrf.mxu1  ;;  %1934 = vpow2.f32 %v1408_v2  ;;  %v1310_v13 = vsub.f32 0.0, %v1136_v9  ;;  %v756_v14 = vadd.f32 %v2704_v63, %v755_v11 }
 0x1a3   : > { %v1923_v15 = vpop.eup %1922  ;;  %1936 = vrcp.f32 %v1497_v10  ;;  %v757_v16 = vpop.f32.mrf.mxu0 }
 0x1a4   : > { %v1142_v17 = vpop.f32.mrf.mxu1  ;;  %v1925_v18 = vpop.eup %1924  ;;  %v1498_v19 = vadd.f32 1.0, %v1923_v15  ;;  %v1410_v20 = vmul.f32 1.442695, %v1310_v13  ;;  %v1141_v21 = vadd.f32 %v1140_v12, %v756_v14 }
 0x1a5   : > { %1687 = vst.msk [vmem:[%s2614_s25 + $0xe0] sm:$0xff] %vm1658_vm0, %v1925_v18  ;;  %v760_v22 = vpop.f32.mrf.mxu0 }
 0x1a6   : > { %v1145_v23 = vpop.f32.mrf.mxu1  ;;  %1938 = vrcp.f32 %v1498_v19  ;;  %v1311_v24 = vsub.f32 0.0, %v1141_v21  ;;  %v761_v25 = vadd.f32 %v2704_v63, %v760_v22 }
 0x1a7   : > { %v1927_v26 = vpop.eup %1926  ;;  %1940 = vpow2.f32 %v1410_v20  ;;  %v762_v27 = vpop.f32.mrf.mxu0 }
 0x1a8   : > { %v1147_v28 = vpop.f32.mrf.mxu1  ;;  %v1929_v29 = vpop.eup %1928  ;;  %v1499_v30 = vadd.f32 1.0, %v1927_v26  ;;  %v1412_v31 = vmul.f32 1.442695, %v1311_v24  ;;  %v1146_v32 = vadd.f32 %v1145_v23, %v761_v25 }
 0x1a9   : > { %1688 = vst.msk [vmem:[%s2614_s25 + $0xe8] sm:$0xff] %vm1658_vm0, %v1929_v29  ;;  %v765_v33 = vpop.f32.mrf.mxu0 }
 0x1aa   : > { %v1150_v34 = vpop.f32.mrf.mxu1  ;;  %1942 = vrcp.f32 %v1499_v30  ;;  %v1312_v35 = vsub.f32 0.0, %v1146_v32  ;;  %v766_v36 = vadd.f32 %v2704_v63, %v765_v33 }
 0x1ab   : > { %v1931_v37 = vpop.eup %1930  ;;  %1944 = vpow2.f32 %v1412_v31  ;;  %v767_v38 = vpop.f32.mrf.mxu0 }
 0x1ac   : > { %v1152_v39 = vpop.f32.mrf.mxu1  ;;  %v1933_v40 = vpop.eup %1932  ;;  %v1500_v41 = vadd.f32 1.0, %v1931_v37  ;;  %v1414_v42 = vmul.f32 1.442695, %v1312_v35  ;;  %v1151_v43 = vadd.f32 %v1150_v34, %v766_v36 }
 0x1ad   : > { %1689 = vst.msk [vmem:[%s2614_s25 + $0xf0] sm:$0xff] %vm1658_vm0, %v1933_v40  ;;  %v770_v44 = vpop.f32.mrf.mxu0 }
 0x1ae   : > { %v1155_v45 = vpop.f32.mrf.mxu1  ;;  %1946 = vrcp.f32 %v1500_v41  ;;  %v1313_v46 = vsub.f32 0.0, %v1151_v43  ;;  %v771_v47 = vadd.f32 %v2704_v63, %v770_v44 }
 0x1af   : > { %v1935_v48 = vpop.eup %1934  ;;  %1948 = vpow2.f32 %v1414_v42  ;;  %v772_v49 = vpop.f32.mrf.mxu0 }
 0x1b0   : > { %v1157_v50 = vpop.f32.mrf.mxu1  ;;  %v1937_v51 = vpop.eup %1936  ;;  %v1501_v52 = vadd.f32 1.0, %v1935_v48  ;;  %v1416_v53 = vmul.f32 1.442695, %v1313_v46  ;;  %v1156_v54 = vadd.f32 %v1155_v45, %v771_v47 }
 0x1b1   : > { %1690 = vst.msk [vmem:[%s2614_s25 + $0xf8] sm:$0xff] %vm1658_vm0, %v1937_v51  ;;  %v775_v55 = vpop.f32.mrf.mxu0 }
 0x1b2   : > { %v1160_v56 = vpop.f32.mrf.mxu1  ;;  %1950 = vrcp.f32 %v1501_v52  ;;  %v1314_v57 = vsub.f32 0.0, %v1156_v54  ;;  %v776_v58 = vadd.f32 %v2704_v63, %v775_v55 }
 0x1b3   : > { %v1939_v59 = vpop.eup %1938  ;;  %1952 = vpow2.f32 %v1416_v53  ;;  %v777_v60 = vpop.f32.mrf.mxu0 }
 0x1b4   : > { %v1162_v61 = vpop.f32.mrf.mxu1  ;;  %v1941_v62 = vpop.eup %1940  ;;  %1691 = vst.msk [vmem:[%s2614_s25 + $0x100] sm:$0xff] %vm1658_vm0, %v1939_v59  ;;  %v1418_v6 = vmul.f32 1.442695, %v1314_v57  ;;  %v1161_v0 = vadd.f32 %v1160_v56, %v776_v58 }
 0x1b5   : > { %v1502_v1 = vadd.f32 1.0, %v1941_v62  ;;  %v780_v3 = vpop.f32.mrf.mxu0 }
 0x1b6   : > { %v1165_v4 = vpop.f32.mrf.mxu1  ;;  %1954 = vpow2.f32 %v1418_v6  ;;  %v1315_v5 = vsub.f32 0.0, %v1161_v0  ;;  %v781_v7 = vadd.f32 %v2704_v63, %v780_v3 }
 0x1b7   : > { %v1943_v8 = vpop.eup %1942  ;;  %1956 = vrcp.f32 %v1502_v1  ;;  %v782_v2 = vpop.f32.mrf.mxu0 }
 0x1b8   : > { %v1167_v9 = vpop.f32.mrf.mxu1  ;;  %v1945_v10 = vpop.eup %1944  ;;  %1692 = vst.msk [vmem:[%s2614_s25 + $0x108] sm:$0xff] %vm1658_vm0, %v1943_v8  ;;  %v1420_v11 = vmul.f32 1.442695, %v1315_v5  ;;  %v1166_v12 = vadd.f32 %v1165_v4, %v781_v7 }
 0x1b9   : > { %v1503_v13 = vadd.f32 1.0, %v1945_v10  ;;  %v785_v14 = vpop.f32.mrf.mxu0 }
 0x1ba   : > { %v1170_v15 = vpop.f32.mrf.mxu1  ;;  %1958 = vpow2.f32 %v1420_v11  ;;  %v1316_v16 = vsub.f32 0.0, %v1166_v12  ;;  %v786_v17 = vadd.f32 %v2704_v63, %v785_v14 }
 0x1bb   : > { %v1947_v18 = vpop.eup %1946  ;;  %1960 = vrcp.f32 %v1503_v13  ;;  %v787_v19 = vpop.f32.mrf.mxu0 }
 0x1bc   : > { %v1172_v20 = vpop.f32.mrf.mxu1  ;;  %v1949_v21 = vpop.eup %1948  ;;  %1693 = vst.msk [vmem:[%s2614_s25 + $0x110] sm:$0xff] %vm1658_vm0, %v1947_v18  ;;  %v1422_v22 = vmul.f32 1.442695, %v1316_v16  ;;  %v1171_v23 = vadd.f32 %v1170_v15, %v786_v17 }
 0x1bd   : > { %v1504_v24 = vadd.f32 1.0, %v1949_v21  ;;  %v790_v25 = vpop.f32.mrf.mxu0 }
 0x1be   : > { %v1175_v26 = vpop.f32.mrf.mxu1  ;;  %1962 = vpow2.f32 %v1422_v22  ;;  %v1317_v27 = vsub.f32 0.0, %v1171_v23  ;;  %v791_v28 = vadd.f32 %v2704_v63, %v790_v25 }
 0x1bf   : > { %v1951_v29 = vpop.eup %1950  ;;  %1964 = vrcp.f32 %v1504_v24  ;;  %v792_v30 = vpop.f32.mrf.mxu0 }
 0x1c0   : > { %v1177_v31 = vpop.f32.mrf.mxu1  ;;  %v1953_v32 = vpop.eup %1952  ;;  %1694 = vst.msk [vmem:[%s2614_s25 + $0x118] sm:$0xff] %vm1658_vm0, %v1951_v29  ;;  %v1424_v33 = vmul.f32 1.442695, %v1317_v27  ;;  %v1176_v34 = vadd.f32 %v1175_v26, %v791_v28 }
 0x1c1   : > { %v1505_v35 = vadd.f32 1.0, %v1953_v32  ;;  %v795_v36 = vpop.f32.mrf.mxu0 }
 0x1c2   : > { %v1180_v37 = vpop.f32.mrf.mxu1  ;;  %1966 = vpow2.f32 %v1424_v33  ;;  %v1318_v38 = vsub.f32 0.0, %v1176_v34  ;;  %v796_v39 = vadd.f32 %v2704_v63, %v795_v36 }
 0x1c3   : > { %v1955_v40 = vpop.eup %1954  ;;  %1968 = vrcp.f32 %v1505_v35  ;;  %v797_v41 = vpop.f32.mrf.mxu0 }
 0x1c4   : > { %v1182_v42 = vpop.f32.mrf.mxu1  ;;  %v1957_v43 = vpop.eup %1956  ;;  %v1506_v44 = vadd.f32 1.0, %v1955_v40  ;;  %v1426_v45 = vmul.f32 1.442695, %v1318_v38  ;;  %v1181_v46 = vadd.f32 %v1180_v37, %v796_v39 }
 0x1c5   : > { %1695 = vst.msk [vmem:[%s2614_s25 + $0x120] sm:$0xff] %vm1658_vm0, %v1957_v43  ;;  %v800_v47 = vpop.f32.mrf.mxu0 }
 0x1c6   : > { %v1185_v48 = vpop.f32.mrf.mxu1  ;;  %1970 = vrcp.f32 %v1506_v44  ;;  %v1319_v49 = vsub.f32 0.0, %v1181_v46  ;;  %v801_v50 = vadd.f32 %v2704_v63, %v800_v47 }
 0x1c7   : > { %v1959_v51 = vpop.eup %1958  ;;  %1972 = vpow2.f32 %v1426_v45  ;;  %v802_v52 = vpop.f32.mrf.mxu0 }
 0x1c8   : > { %v1187_v53 = vpop.f32.mrf.mxu1  ;;  %v1961_v54 = vpop.eup %1960  ;;  %v1507_v55 = vadd.f32 1.0, %v1959_v51  ;;  %v1428_v56 = vmul.f32 1.442695, %v1319_v49  ;;  %v1186_v57 = vadd.f32 %v1185_v48, %v801_v50 }
 0x1c9   : > { %1696 = vst.msk [vmem:[%s2614_s25 + $0x128] sm:$0xff] %vm1658_vm0, %v1961_v54  ;;  %v805_v58 = vpop.f32.mrf.mxu0 }
 0x1ca   : > { %v1190_v59 = vpop.f32.mrf.mxu1  ;;  %1974 = vrcp.f32 %v1507_v55  ;;  %v1320_v60 = vsub.f32 0.0, %v1186_v57  ;;  %v806_v61 = vadd.f32 %v2704_v63, %v805_v58 }
 0x1cb   : > { %v1963_v62 = vpop.eup %1962  ;;  %1976 = vpow2.f32 %v1428_v56  ;;  %v807_v6 = vpop.f32.mrf.mxu0 }
 0x1cc   : > { %v1192_v0 = vpop.f32.mrf.mxu1  ;;  %v1965_v1 = vpop.eup %1964  ;;  %v1508_v3 = vadd.f32 1.0, %v1963_v62  ;;  %v1430_v4 = vmul.f32 1.442695, %v1320_v60  ;;  %v1191_v5 = vadd.f32 %v1190_v59, %v806_v61 }
 0x1cd   : > { %1697 = vst.msk [vmem:[%s2614_s25 + $0x130] sm:$0xff] %vm1658_vm0, %v1965_v1  ;;  %v810_v7 = vpop.f32.mrf.mxu0 }
 0x1ce   : > { %v1195_v8 = vpop.f32.mrf.mxu1  ;;  %1978 = vrcp.f32 %v1508_v3  ;;  %v1321_v2 = vsub.f32 0.0, %v1191_v5  ;;  %v811_v9 = vadd.f32 %v2704_v63, %v810_v7 }
 0x1cf   : > { %v1967_v10 = vpop.eup %1966  ;;  %1980 = vpow2.f32 %v1430_v4  ;;  %v812_v11 = vpop.f32.mrf.mxu0 }
 0x1d0   : > { %v1197_v12 = vpop.f32.mrf.mxu1  ;;  %v1969_v13 = vpop.eup %1968  ;;  %v1509_v14 = vadd.f32 1.0, %v1967_v10  ;;  %v1432_v15 = vmul.f32 1.442695, %v1321_v2  ;;  %v1196_v16 = vadd.f32 %v1195_v8, %v811_v9 }
 0x1d1   : > { %1698 = vst.msk [vmem:[%s2614_s25 + $0x138] sm:$0xff] %vm1658_vm0, %v1969_v13  ;;  %v815_v17 = vpop.f32.mrf.mxu0 }
 0x1d2   : > { %v1200_v18 = vpop.f32.mrf.mxu1  ;;  %1982 = vrcp.f32 %v1509_v14  ;;  %v1322_v19 = vsub.f32 0.0, %v1196_v16  ;;  %v816_v20 = vadd.f32 %v2704_v63, %v815_v17 }
 0x1d3   : > { %v1971_v21 = vpop.eup %1970  ;;  %1984 = vpow2.f32 %v1432_v15  ;;  %v817_v22 = vpop.f32.mrf.mxu0 }
 0x1d4   : > { %v1202_v23 = vpop.f32.mrf.mxu1  ;;  %v1973_v24 = vpop.eup %1972  ;;  %1699 = vst.msk [vmem:[%s2614_s25 + $0x140] sm:$0xff] %vm1658_vm0, %v1971_v21  ;;  %v1434_v25 = vmul.f32 1.442695, %v1322_v19  ;;  %v1201_v26 = vadd.f32 %v1200_v18, %v816_v20 }
 0x1d5   : > { %v1510_v27 = vadd.f32 1.0, %v1973_v24  ;;  %v820_v28 = vpop.f32.mrf.mxu0 }
 0x1d6   : > { %v1205_v29 = vpop.f32.mrf.mxu1  ;;  %1986 = vpow2.f32 %v1434_v25  ;;  %v1323_v30 = vsub.f32 0.0, %v1201_v26  ;;  %v821_v31 = vadd.f32 %v2704_v63, %v820_v28 }
 0x1d7   : > { %v1975_v32 = vpop.eup %1974  ;;  %1988 = vrcp.f32 %v1510_v27  ;;  %v822_v33 = vpop.f32.mrf.mxu0 }
 0x1d8   : > { %v1207_v34 = vpop.f32.mrf.mxu1  ;;  %v1977_v35 = vpop.eup %1976  ;;  %1700 = vst.msk [vmem:[%s2614_s25 + $0x148] sm:$0xff] %vm1658_vm0, %v1975_v32  ;;  %v1436_v36 = vmul.f32 1.442695, %v1323_v30  ;;  %v1206_v37 = vadd.f32 %v1205_v29, %v821_v31 }
 0x1d9   : > { %v1511_v38 = vadd.f32 1.0, %v1977_v35  ;;  %v825_v39 = vpop.f32.mrf.mxu0 }
 0x1da   : > { %v1210_v40 = vpop.f32.mrf.mxu1  ;;  %1990 = vpow2.f32 %v1436_v36  ;;  %v1324_v41 = vsub.f32 0.0, %v1206_v37  ;;  %v826_v42 = vadd.f32 %v2704_v63, %v825_v39 }
 0x1db   : > { %v1979_v43 = vpop.eup %1978  ;;  %1992 = vrcp.f32 %v1511_v38  ;;  %v827_v44 = vpop.f32.mrf.mxu0 }
 0x1dc   : > { %v1212_v45 = vpop.f32.mrf.mxu1  ;;  %v1981_v46 = vpop.eup %1980  ;;  %1701 = vst.msk [vmem:[%s2614_s25 + $0x150] sm:$0xff] %vm1658_vm0, %v1979_v43  ;;  %v1438_v47 = vmul.f32 1.442695, %v1324_v41  ;;  %v1211_v48 = vadd.f32 %v1210_v40, %v826_v42 }
 0x1dd   : > { %v1512_v49 = vadd.f32 1.0, %v1981_v46  ;;  %v830_v50 = vpop.f32.mrf.mxu0 }
 0x1de   : > { %v1215_v51 = vpop.f32.mrf.mxu1  ;;  %1994 = vpow2.f32 %v1438_v47  ;;  %v1325_v52 = vsub.f32 0.0, %v1211_v48  ;;  %v831_v53 = vadd.f32 %v2704_v63, %v830_v50 }
 0x1df   : > { %v1983_v54 = vpop.eup %1982  ;;  %1996 = vrcp.f32 %v1512_v49  ;;  %v832_v55 = vpop.f32.mrf.mxu0 }
 0x1e0   : > { %v1217_v56 = vpop.f32.mrf.mxu1  ;;  %v1985_v57 = vpop.eup %1984  ;;  %1702 = vst.msk [vmem:[%s2614_s25 + $0x158] sm:$0xff] %vm1658_vm0, %v1983_v54  ;;  %v1440_v58 = vmul.f32 1.442695, %v1325_v52  ;;  %v1216_v59 = vadd.f32 %v1215_v51, %v831_v53 }
 0x1e1   : > { %v1513_v60 = vadd.f32 1.0, %v1985_v57  ;;  %v835_v61 = vpop.f32.mrf.mxu0 }
 0x1e2   : > { %v1220_v62 = vpop.f32.mrf.mxu1  ;;  %1998 = vpow2.f32 %v1440_v58  ;;  %v1326_v6 = vsub.f32 0.0, %v1216_v59  ;;  %v836_v0 = vadd.f32 %v2704_v63, %v835_v61 }
 0x1e3   : > { %v1987_v1 = vpop.eup %1986  ;;  %2000 = vrcp.f32 %v1513_v60  ;;  %v837_v3 = vpop.f32.mrf.mxu0 }
 0x1e4   : > { %v1222_v4 = vpop.f32.mrf.mxu1  ;;  %v1989_v5 = vpop.eup %1988  ;;  %v1514_v7 = vadd.f32 1.0, %v1987_v1  ;;  %v1442_v8 = vmul.f32 1.442695, %v1326_v6  ;;  %v1221_v2 = vadd.f32 %v1220_v62, %v836_v0 }
 0x1e5   : > { %1703 = vst.msk [vmem:[%s2614_s25 + $0x160] sm:$0xff] %vm1658_vm0, %v1989_v5  ;;  %v840_v9 = vpop.f32.mrf.mxu0 }
 0x1e6   : > { %v1225_v10 = vpop.f32.mrf.mxu1  ;;  %2002 = vrcp.f32 %v1514_v7  ;;  %v1327_v11 = vsub.f32 0.0, %v1221_v2  ;;  %v841_v12 = vadd.f32 %v2704_v63, %v840_v9 }
 0x1e7   : > { %v1991_v13 = vpop.eup %1990  ;;  %2004 = vpow2.f32 %v1442_v8  ;;  %v842_v14 = vpop.f32.mrf.mxu0 }
 0x1e8   : > { %v1227_v15 = vpop.f32.mrf.mxu1  ;;  %v1993_v16 = vpop.eup %1992  ;;  %v1515_v17 = vadd.f32 1.0, %v1991_v13  ;;  %v1444_v18 = vmul.f32 1.442695, %v1327_v11  ;;  %v1226_v19 = vadd.f32 %v1225_v10, %v841_v12 }
 0x1e9   : > { %1704 = vst.msk [vmem:[%s2614_s25 + $0x168] sm:$0xff] %vm1658_vm0, %v1993_v16  ;;  %v845_v20 = vpop.f32.mrf.mxu0 }
 0x1ea   : > { %v1230_v21 = vpop.f32.mrf.mxu1  ;;  %2006 = vrcp.f32 %v1515_v17  ;;  %v1328_v22 = vsub.f32 0.0, %v1226_v19  ;;  %v846_v23 = vadd.f32 %v2704_v63, %v845_v20 }
 0x1eb   : > { %v1995_v24 = vpop.eup %1994  ;;  %2008 = vpow2.f32 %v1444_v18  ;;  %v847_v25 = vpop.f32.mrf.mxu0 }
 0x1ec   : > { %v1232_v26 = vpop.f32.mrf.mxu1  ;;  %v1997_v27 = vpop.eup %1996  ;;  %v1516_v28 = vadd.f32 1.0, %v1995_v24  ;;  %v1446_v29 = vmul.f32 1.442695, %v1328_v22  ;;  %v1231_v30 = vadd.f32 %v1230_v21, %v846_v23 }
 0x1ed   : > { %1705 = vst.msk [vmem:[%s2614_s25 + $0x170] sm:$0xff] %vm1658_vm0, %v1997_v27  ;;  %v850_v31 = vpop.f32.mrf.mxu0 }
 0x1ee   : > { %v1235_v32 = vpop.f32.mrf.mxu1  ;;  %2010 = vrcp.f32 %v1516_v28  ;;  %v1329_v33 = vsub.f32 0.0, %v1231_v30  ;;  %v851_v34 = vadd.f32 %v2704_v63, %v850_v31 }
 0x1ef   : > { %v1999_v35 = vpop.eup %1998  ;;  %2012 = vpow2.f32 %v1446_v29  ;;  %v852_v36 = vpop.f32.mrf.mxu0 }
 0x1f0   : > { %v1237_v37 = vpop.f32.mrf.mxu1  ;;  %v2001_v38 = vpop.eup %2000  ;;  %v1517_v39 = vadd.f32 1.0, %v1999_v35  ;;  %v1448_v40 = vmul.f32 1.442695, %v1329_v33  ;;  %v1236_v41 = vadd.f32 %v1235_v32, %v851_v34 }
 0x1f1   : > { %1706 = vst.msk [vmem:[%s2614_s25 + $0x178] sm:$0xff] %vm1658_vm0, %v2001_v38  ;;  %v855_v42 = vpop.f32.mrf.mxu0 }
 0x1f2   : > { %v1240_v43 = vpop.f32.mrf.mxu1  ;;  %2014 = vrcp.f32 %v1517_v39  ;;  %v1330_v44 = vsub.f32 0.0, %v1236_v41  ;;  %v856_v45 = vadd.f32 %v2704_v63, %v855_v42 }
 0x1f3   : > { %v2003_v46 = vpop.eup %2002  ;;  %2016 = vpow2.f32 %v1448_v40  ;;  %v857_v47 = vpop.f32.mrf.mxu0 }
 0x1f4   : > { %v1242_v48 = vpop.f32.mrf.mxu1  ;;  %v2005_v49 = vpop.eup %2004  ;;  %1707 = vst.msk [vmem:[%s2614_s25 + $0x180] sm:$0xff] %vm1658_vm0, %v2003_v46  ;;  %v1450_v50 = vmul.f32 1.442695, %v1330_v44  ;;  %v1241_v51 = vadd.f32 %v1240_v43, %v856_v45 }
 0x1f5   : > { %v1518_v52 = vadd.f32 1.0, %v2005_v49  ;;  %v860_v53 = vpop.f32.mrf.mxu0 }
 0x1f6   : > { %v1245_v54 = vpop.f32.mrf.mxu1  ;;  %2018 = vpow2.f32 %v1450_v50  ;;  %v1331_v55 = vsub.f32 0.0, %v1241_v51  ;;  %v861_v56 = vadd.f32 %v2704_v63, %v860_v53 }
 0x1f7   : > { %v2007_v57 = vpop.eup %2006  ;;  %2020 = vrcp.f32 %v1518_v52  ;;  %v862_v58 = vpop.f32.mrf.mxu0 }
 0x1f8   : > { %v1247_v59 = vpop.f32.mrf.mxu1  ;;  %v2009_v60 = vpop.eup %2008  ;;  %1708 = vst.msk [vmem:[%s2614_s25 + $0x188] sm:$0xff] %vm1658_vm0, %v2007_v57  ;;  %v1452_v61 = vmul.f32 1.442695, %v1331_v55  ;;  %v1246_v62 = vadd.f32 %v1245_v54, %v861_v56 }
 0x1f9   : > { %v1519_v6 = vadd.f32 1.0, %v2009_v60  ;;  %v865_v0 = vpop.f32.mrf.mxu0 }
 0x1fa   : > { %v1250_v1 = vpop.f32.mrf.mxu1  ;;  %2022 = vpow2.f32 %v1452_v61  ;;  %v1332_v3 = vsub.f32 0.0, %v1246_v62  ;;  %v866_v4 = vadd.f32 %v2704_v63, %v865_v0 }
 0x1fb   : > { %v2011_v5 = vpop.eup %2010  ;;  %2024 = vrcp.f32 %v1519_v6  ;;  %v867_v7 = vpop.f32.mrf.mxu0 }
 0x1fc   : > { %v1252_v8 = vpop.f32.mrf.mxu1  ;;  %v2013_v2 = vpop.eup %2012  ;;  %1709 = vst.msk [vmem:[%s2614_s25 + $0x190] sm:$0xff] %vm1658_vm0, %v2011_v5  ;;  %v1454_v9 = vmul.f32 1.442695, %v1332_v3  ;;  %v1251_v10 = vadd.f32 %v1250_v1, %v866_v4 }
 0x1fd   : > { %v1520_v11 = vadd.f32 1.0, %v2013_v2  ;;  %v870_v12 = vpop.f32.mrf.mxu0 }
 0x1fe   : > { %v1255_v13 = vpop.f32.mrf.mxu1  ;;  %2026 = vpow2.f32 %v1454_v9  ;;  %v1333_v14 = vsub.f32 0.0, %v1251_v10  ;;  %v871_v15 = vadd.f32 %v2704_v63, %v870_v12 }
 0x1ff   : > { %v2015_v16 = vpop.eup %2014  ;;  %2028 = vrcp.f32 %v1520_v11  ;;  %v872_v17 = vpop.f32.mrf.mxu0 }
 0x200   : > { %v1257_v18 = vpop.f32.mrf.mxu1  ;;  %v2017_v19 = vpop.eup %2016  ;;  %1710 = vst.msk [vmem:[%s2614_s25 + $0x198] sm:$0xff] %vm1658_vm0, %v2015_v16  ;;  %v1456_v20 = vmul.f32 1.442695, %v1333_v14  ;;  %v1256_v21 = vadd.f32 %v1255_v13, %v871_v15 }
 0x201   : > { %v1521_v22 = vadd.f32 1.0, %v2017_v19  ;;  %v875_v23 = vpop.f32.mrf.mxu0 }
 0x202   : > { %v1260_v24 = vpop.f32.mrf.mxu1  ;;  %2030 = vpow2.f32 %v1456_v20  ;;  %v1334_v25 = vsub.f32 0.0, %v1256_v21  ;;  %v876_v26 = vadd.f32 %v2704_v63, %v875_v23 }
 0x203   : > { %v2019_v27 = vpop.eup %2018  ;;  %2032 = vrcp.f32 %v1521_v22  ;;  %v877_v28 = vpop.f32.mrf.mxu0 }
 0x204   : > { %v1262_v29 = vpop.f32.mrf.mxu1  ;;  %v2021_v30 = vpop.eup %2020  ;;  %v1522_v31 = vadd.f32 1.0, %v2019_v27  ;;  %v1458_v32 = vmul.f32 1.442695, %v1334_v25  ;;  %v1261_v33 = vadd.f32 %v1260_v24, %v876_v26 }
 0x205   : > { %1711 = vst.msk [vmem:[%s2614_s25 + $0x1a0] sm:$0xff] %vm1658_vm0, %v2021_v30  ;;  %v880_v34 = vpop.f32.mrf.mxu0 }
 0x206   : > { %v1265_v35 = vpop.f32.mrf.mxu1  ;;  %2034 = vrcp.f32 %v1522_v31  ;;  %v1335_v36 = vsub.f32 0.0, %v1261_v33  ;;  %v881_v37 = vadd.f32 %v2704_v63, %v880_v34 }
 0x207   : > { %v2023_v38 = vpop.eup %2022  ;;  %2036 = vpow2.f32 %v1458_v32  ;;  %v882_v39 = vpop.f32.mrf.mxu0 }
 0x208   : > { %v1267_v40 = vpop.f32.mrf.mxu1  ;;  %v2025_v41 = vpop.eup %2024  ;;  %v1523_v42 = vadd.f32 1.0, %v2023_v38  ;;  %v1460_v43 = vmul.f32 1.442695, %v1335_v36  ;;  %v1266_v44 = vadd.f32 %v1265_v35, %v881_v37 }
 0x209   : > { %1712 = vst.msk [vmem:[%s2614_s25 + $0x1a8] sm:$0xff] %vm1658_vm0, %v2025_v41  ;;  %v885_v45 = vpop.f32.mrf.mxu0 }
 0x20a   : > { %v1270_v46 = vpop.f32.mrf.mxu1  ;;  %2038 = vrcp.f32 %v1523_v42  ;;  %v1336_v47 = vsub.f32 0.0, %v1266_v44  ;;  %v886_v48 = vadd.f32 %v2704_v63, %v885_v45 }
 0x20b   : > { %v2027_v49 = vpop.eup %2026  ;;  %2040 = vpow2.f32 %v1460_v43  ;;  %v887_v50 = vpop.f32.mrf.mxu0 }
 0x20c   : > { %v1272_v51 = vpop.f32.mrf.mxu1  ;;  %v2029_v52 = vpop.eup %2028  ;;  %v1524_v53 = vadd.f32 1.0, %v2027_v49  ;;  %v1462_v54 = vmul.f32 1.442695, %v1336_v47  ;;  %v1271_v55 = vadd.f32 %v1270_v46, %v886_v48 }
 0x20d   : > { %1713 = vst.msk [vmem:[%s2614_s25 + $0x1b0] sm:$0xff] %vm1658_vm0, %v2029_v52 }
 0x20e   : > { %2042 = vrcp.f32 %v1524_v53  ;;  %v1337_v56 = vsub.f32 0.0, %v1271_v55 }
 0x20f   : > { %v2031_v57 = vpop.eup %2030  ;;  %2044 = vpow2.f32 %v1462_v54 }
 0x210   : > { %v2033_v58 = vpop.eup %2032  ;;  %v1525_v59 = vadd.f32 1.0, %v2031_v57  ;;  %v1464_v63 = vmul.f32 1.442695, %v1337_v56 }
 0x211   : > { %1714 = vst.msk [vmem:[%s2614_s25 + $0x1b8] sm:$0xff] %vm1658_vm0, %v2033_v58 }
 0x212   : > { %2046 = vrcp.f32 %v1525_v59 }
 0x213   : > { %v2035_v60 = vpop.eup %2034  ;;  %2048 = vpow2.f32 %v1464_v63 }
 0x214   : > { %v2037_v61 = vpop.eup %2036  ;;  %1715 = vst.msk [vmem:[%s2614_s25 + $0x1c0] sm:$0xff] %vm1658_vm0, %v2035_v60 }
 0x215   : > { %v1526_v62 = vadd.f32 1.0, %v2037_v61 }
 0x217   : > { %v2039_v6 = vpop.eup %2038  ;;  %2050 = vrcp.f32 %v1526_v62 }
 0x218   : > { %v2041_v0 = vpop.eup %2040  ;;  %1716 = vst.msk [vmem:[%s2614_s25 + $0x1c8] sm:$0xff] %vm1658_vm0, %v2039_v6 }
 0x219   : > { %v1527_v1 = vadd.f32 1.0, %v2041_v0 }
 0x21b   : > { %v2043_v3 = vpop.eup %2042  ;;  %2052 = vrcp.f32 %v1527_v1 }
 0x21c   : > { %v2045_v4 = vpop.eup %2044  ;;  %1717 = vst.msk [vmem:[%s2614_s25 + $0x1d0] sm:$0xff] %vm1658_vm0, %v2043_v3 }
 0x21d   : > { %v1528_v5 = vadd.f32 1.0, %v2045_v4 }
 0x21f   : > { %v2047_v7 = vpop.eup %2046  ;;  %2054 = vrcp.f32 %v1528_v5 }
 0x220   : > { %v2049_v8 = vpop.eup %2048  ;;  %1718 = vst.msk [vmem:[%s2614_s25 + $0x1d8] sm:$0xff] %vm1658_vm0, %v2047_v7 }
 0x221   : > { %v1529_v2 = vadd.f32 1.0, %v2049_v8 }
 0x223   : > { %2056 = vrcp.f32 %v1529_v2 }
 0x224   : > { %v2051_v9 = vpop.eup %2050 }
 0x225   : > { %1719 = vst.msk [vmem:[%s2614_s25 + $0x1e0] sm:$0xff] %vm1658_vm0, %v2051_v9 }
 0x228   : > { %v2053_v10 = vpop.eup %2052 }
 0x229   : > { %1720 = vst.msk [vmem:[%s2614_s25 + $0x1e8] sm:$0xff] %vm1658_vm0, %v2053_v10 }
 0x22c   : > { %v2055_v11 = vpop.eup %2054 }
 0x22d   : > { %1721 = vst.msk [vmem:[%s2614_s25 + $0x1f0] sm:$0xff] %vm1658_vm0, %v2055_v11 }
 0x230   : > { %v2057_v12 = vpop.eup %2056 }
 0x231   : > { %1722 = vst.msk [vmem:[%s2614_s25 + $0x1f8] sm:$0xff] %vm1658_vm0, %v2057_v12 }
 0x232 PF: > { %s13_s12 = sadd.s32 1, %s2065_s12  }
 0x233   : > { %p10_p4 = scmp.ge.s32.totalorder %s13_s12, 8  }
 0x235   :  { %12 = sbr.rel (!%p10_p4) target bundleno = 1 (0x1), region = 62 }

</bundles_post_ra>
